<compile_context>
chip_gen: v7x
topology: tpu7x:2x2x1
jax: 0.10.0
libtpu: 0.0.40
codegen_flags: <defaults>
</compile_context>

<pallas_src>
import math
import functools

import jax
import jax.numpy as jnp
from jax.experimental import pallas as pl
from jax.experimental.pallas import tpu as pltpu
import numpy as np


def _encoder_kernel(el_ref, x_ref, eigs_ref, i0c_ref, i0r_ref, i1c_ref, pe_ref,
                    out_ref, zq_ref, zk_ref, acc_ref, *, inv_sqrt_dim):
    N, D = x_ref.shape
    De = eigs_ref.shape[1]
    TE = i0c_ref.shape[0]        # edge-tile size
    t = pl.program_id(0)

    # ---------------- one-time init: layer norm + fused gather slabs -----------------
    @pl.when(t == 0)
    def _init():
        x = x_ref[...]
        mu = jnp.mean(x, axis=-1, keepdims=True)
        xc = x - mu
        var = jnp.mean(xc * xc, axis=-1, keepdims=True)
        y = xc * jax.lax.rsqrt(var + 1e-5)                       # (N, D), f32
        eigs = eigs_ref[...]                                     # (N, De)
        el = el_ref[0]                                           # exp(lambda0), SMEM scalar
        # "query-side" slab carries the scaling so one row-dot gives the full score.
        zq_ref[...] = jnp.concatenate(
            [y * inv_sqrt_dim, eigs * el], axis=-1).astype(jnp.bfloat16)
        # "key-side" slab is unscaled so its y-part is reused directly for the SpMM.
        zk_ref[...] = jnp.concatenate([y, eigs], axis=-1).astype(jnp.bfloat16)
        acc_ref[...] = jnp.zeros_like(acc_ref)

    # ------------- per-tile: build bf16 one-hots in-register from int32 ids ----------
    i0c = i0c_ref[...]                                           # (TE, 1) int32 rows
    i1c = i1c_ref[...]                                           # (TE, 1) int32 cols
    i0r = i0r_ref[...]                                           # (1, TE) int32 rows (transposed)
    iota_en = jax.lax.broadcasted_iota(jnp.int32, (TE, N), 1)
    iota_ne = jax.lax.broadcasted_iota(jnp.int32, (N, TE), 0)
    R = jnp.where(i0c == iota_en, 1.0, 0.0).astype(jnp.bfloat16)   # (TE, N) gather selector
    C = jnp.where(i1c == iota_en, 1.0, 0.0).astype(jnp.bfloat16)   # (TE, N) gather selector
    RT = jnp.where(i0r == iota_ne, 1.0, 0.0).astype(jnp.bfloat16)  # (N, TE) scatter selector
    # (padded edges carry endpoint id == N -> all-zero rows/cols -> contribute nothing)

    # ------------- fused edge gathers (bf16 MXU, f32 accumulation) --------------------
    qz = jnp.dot(R, zq_ref[...], preferred_element_type=jnp.float32)   # (TE, D+De)
    kz = jnp.dot(C, zk_ref[...], preferred_element_type=jnp.float32)   # (TE, D+De)

    # score0 = <y[i0],y[i1]>/sqrt(D) + exp(lambda0)*<eigs[i0],eigs[i1]>  (single row-dot)
    s0 = jnp.sum(qz * kz, axis=-1, keepdims=True)                      # (TE, 1)
    sv = jnp.concatenate([s0, pe_ref[...]], axis=-1)                   # (TE, 2) both branches
    v = jnp.minimum(jnp.exp(sv), 5.0)                                  # clamp(exp, -5, 5); lower bound dead

    ke = kz[:, :D]                                                     # (TE, D) = y[i1] (reused, no extra C@y)

    # single scatter matmul per tile: [v0*y[i1] | v1*y[i1] | v0 | v1]  ->  (N, 2D+2) accumulator
    contrib = jnp.concatenate([v[:, 0:1] * ke, v[:, 1:2] * ke, v], axis=-1)
    acc_ref[...] += jnp.dot(RT, contrib.astype(jnp.bfloat16),
                            preferred_element_type=jnp.float32)

    # ---------------- finalize: per-row normalization + mean of branches --------------
    @pl.when(t == pl.num_programs(0) - 1)
    def _finalize():
        acc = acc_ref[...]
        rs = acc[:, 2 * D:2 * D + 2]                                   # (N, 2) row sums
        rs = jnp.where(rs == 0.0, 1.0, rs)
        rinv = pl.reciprocal(rs, approx=True)                          # EUP, free slot
        out_ref[...] = 0.5 * (acc[:, :D] * rinv[:, 0:1]
                              + acc[:, D:2 * D] * rinv[:, 1:2])


def encoder_forward(x, eigs, i0, i1, pe, lambda0, hidden_dim, *, tile_e=128):
    """x: (N, D) f32, eigs: (N, De) f32, i0/i1: (E,) int32 edge endpoints,
    pe: (E,) f32 path-embedding value per edge, lambda0: scalar parameter."""
    N, D = x.shape
    De = eigs.shape[1]
    E = int(i0.shape[0])

    # ---- index plumbing (glue): pad E to a tile multiple with inert edges (id == N) ----
    num_tiles = max(1, pl.cdiv(E, tile_e))
    e_pad = num_tiles * tile_e
    pad = e_pad - E
    i0p = jnp.concatenate([i0.astype(jnp.int32), jnp.full((pad,), N, jnp.int32)])
    i1p = jnp.concatenate([i1.astype(jnp.int32), jnp.full((pad,), N, jnp.int32)])
    pep = jnp.concatenate([pe.astype(jnp.float32), jnp.zeros((pad,), jnp.float32)])

    i0_col = i0p.reshape(e_pad, 1)
    i0_row = i0p.reshape(1, e_pad)
    i1_col = i1p.reshape(e_pad, 1)
    pe_col = pep.reshape(e_pad, 1)
    el = jnp.exp(jnp.asarray(lambda0, jnp.float32)).reshape(1)   # exp(lambda0) -> SMEM scalar

    kernel = functools.partial(_encoder_kernel, inv_sqrt_dim=1.0 / math.sqrt(hidden_dim))

    grid_spec = pltpu.PrefetchScalarGridSpec(
        num_scalar_prefetch=1,            # exp(lambda0) lives in SMEM
        grid=(num_tiles,),                # edge-tile axis (accumulation)
        in_specs=[
            pl.BlockSpec((N, D), lambda t, el: (0, 0)),         # x        (resident)
            pl.BlockSpec((N, De), lambda t, el: (0, 0)),        # eigs     (resident)
            pl.BlockSpec((tile_e, 1), lambda t, el: (t, 0)),    # i0 (col form)
            pl.BlockSpec((1, tile_e), lambda t, el: (0, t)),    # i0 (row form, for scatter)
            pl.BlockSpec((tile_e, 1), lambda t, el: (t, 0)),    # i1 (col form)
            pl.BlockSpec((tile_e, 1), lambda t, el: (t, 0)),    # path scores per edge
        ],
        out_specs=pl.BlockSpec((N, D), lambda t, el: (0, 0)),   # resident accumulator target
        scratch_shapes=[
            pltpu.VMEM((N, D + De), jnp.bfloat16),              # zq = [y/sqrt(D) | eigs*exp(lam)]
            pltpu.VMEM((N, D + De), jnp.bfloat16),              # zk = [y | eigs]
            pltpu.VMEM((N, 2 * D + 2), jnp.float32),            # [out0 | out1 | rowsums] accumulator
        ],
    )

    out = pl.pallas_call(
        kernel,
        out_shape=jax.ShapeDtypeStruct((N, D), jnp.float32),
        grid_spec=grid_spec,
        compiler_params=pltpu.CompilerParams(
            dimension_semantics=("arbitrary",),
            vmem_limit_bytes=32 * 1024 * 1024,
        ),
    )(el, x, eigs, i0_col, i0_row, i1_col, pe_col)
    return out


def encoder_reference(x, eigs, i0, i1, pe, lambda0, hidden_dim):
    """Pure-JAX reference matching the PyTorch forward."""
    mu = x.mean(-1, keepdims=True)
    var = ((x - mu) ** 2).mean(-1, keepdims=True)
    y = (x - mu) / jnp.sqrt(var + 1e-5)

    score = (y[i0] * y[i1]).sum(-1) / math.sqrt(hidden_dim)
    escore = (eigs[i0] * eigs[i1]).sum(-1)
    s0 = score + jnp.exp(lambda0) * escore

    def sparse_softmax(vals):
        v = jnp.clip(jnp.exp(vals), -5.0, 5.0)
        rs = jnp.zeros(x.shape[0], jnp.float32).at[i0].add(v)
        rs = jnp.where(rs == 0.0, 1.0, rs)
        return v / rs[i0]

    s = 0.5 * (sparse_softmax(s0) + sparse_softmax(pe))
    out = jnp.zeros_like(y).at[i0].add(s[:, None] * y[i1])
    return out


if __name__ == "__main__":
    # Shapes consistent with the module: Encoder(model='eig+path', sample_hop=3,
    # hidden_dim=32, eigs_dim=16) applied to a 64-node graph; E=144 edges so the
    # kernel runs two edge tiles (exercises tiling + inert padding).
    N, D, De = 64, 32, 16
    sample_hop = 3
    n_path_types = 2 ** (sample_hop + 1) - 2   # 14
    E_per_hop = 48

    key = jax.random.PRNGKey(0)
    kx, keig, kl, kw, *kidx = jax.random.split(key, 4 + sample_hop)

    x = jax.random.normal(kx, (N, D), dtype=jnp.float32)
    eigs = jax.random.normal(keig, (N, De), dtype=jnp.float32) * 0.1

    # Module parameters (lambda0 scalar, path_emb table); small random values so both
    # branches are non-trivial.
    lambda0 = jax.random.normal(kl, (), dtype=jnp.float32) * 0.1
    path_emb_weight = jax.random.normal(kw, (n_path_types, 1), dtype=jnp.float32) * 0.5

    # indices: list of (2, E_j) edge sets per hop, path_type: list of (E_j,) ids.
    indices_list, path_list = [], []
    for h in range(sample_hop):
        ki, kp = jax.random.split(kidx[h])
        idx = jax.random.randint(ki, (2, E_per_hop), 0, N, dtype=jnp.int32)
        pt = jax.random.randint(kp, (E_per_hop,), 0, n_path_types, dtype=jnp.int32)
        indices_list.append(idx)
        path_list.append(pt)

    i_all = jnp.concatenate(indices_list, axis=-1)           # (2, E)  torch.concat(ni)
    pt_all = jnp.concatenate(path_list, axis=-1)              # (E,)
    i0, i1 = i_all[0], i_all[1]
    pe = path_emb_weight[pt_all, 0]                           # embedding lookup (glue)

    out = encoder_forward(x, eigs, i0, i1, pe, lambda0, hidden_dim=D)
    out = jax.block_until_ready(out)

    ref = encoder_reference(x, eigs, i0, i1, pe, lambda0, hidden_dim=D)
    np.testing.assert_allclose(np.asarray(out), np.asarray(ref), rtol=2e-2, atol=2e-2)

    print("KERNEL_OK")
</pallas_src>

<mosaic_0001>
module attributes {stable_mosaic.version = 11 : i64} {
  func.func @_encoder_kernel(%arg0: i32, %arg1: memref<1xf32, #tpu.memory_space<smem>>, %arg2: memref<64x32xf32, #tpu.memory_space<vmem>>, %arg3: memref<64x16xf32, #tpu.memory_space<vmem>>, %arg4: memref<128x1xi32, #tpu.memory_space<vmem>>, %arg5: memref<1x128xi32, #tpu.memory_space<vmem>>, %arg6: memref<128x1xi32, #tpu.memory_space<vmem>>, %arg7: memref<128x1xf32, #tpu.memory_space<vmem>>, %arg8: memref<64x32xf32, #tpu.memory_space<vmem>>, %arg9: memref<64x48xbf16, #tpu.memory_space<vmem>>, %arg10: memref<64x48xbf16, #tpu.memory_space<vmem>>, %arg11: memref<64x66xf32, #tpu.memory_space<vmem>>) attributes {dimension_semantics = [#tpu.dimension_semantics<arbitrary>], iteration_bounds = array<i64: 2>, scalar_prefetch = 1 : i64, scratch_operands = 3 : i64, tpu.core_type = #tpu.core_type<tc>, window_params = [{pipeline_mode = #tpu.pipeline_mode<synchronous>, transform_indices = @transform_0, window_bounds = array<i64: 64, 32>}, {pipeline_mode = #tpu.pipeline_mode<synchronous>, transform_indices = @transform_1, window_bounds = array<i64: 64, 16>}, {transform_indices = @transform_2, window_bounds = array<i64: 128, 1>}, {transform_indices = @transform_3, window_bounds = array<i64: 1, 128>}, {transform_indices = @transform_4, window_bounds = array<i64: 128, 1>}, {transform_indices = @transform_5, window_bounds = array<i64: 128, 1>}, {pipeline_mode = #tpu.pipeline_mode<synchronous>, transform_indices = @transform_6, window_bounds = array<i64: 64, 32>}]} {
    %c0_i32 = arith.constant 0 : i32
    %0 = arith.cmpi eq, %arg0, %c0_i32 : i32
    %1 = arith.extui %0 : i1 to i32
    %c0_i32_0 = arith.constant 0 : i32
    %2 = arith.cmpi ne, %1, %c0_i32_0 : i32
    scf.if %2 {
      %c0_27 = arith.constant 0 : index
      %c0_28 = arith.constant 0 : index
      %54 = vector.load %arg2[%c0_27, %c0_28] : memref<64x32xf32, #tpu.memory_space<vmem>>, vector<64x32xf32>
      %cst_29 = arith.constant dense<0.000000e+00> : vector<64xf32>
      %55 = vector.multi_reduction <add>, %54, %cst_29 [1] : vector<64x32xf32> to vector<64xf32>
      %56 = vector.shape_cast %55 : vector<64xf32> to vector<64x1xf32>
      %cst_30 = arith.constant 3.200000e+01 : f32
      %57 = vector.broadcast %cst_30 : f32 to vector<64x1xf32>
      %58 = arith.divf %56, %57 : vector<64x1xf32>
      %59 = vector.broadcast %58 : vector<64x1xf32> to vector<64x32xf32>
      %60 = arith.subf %54, %59 : vector<64x32xf32>
      %61 = arith.mulf %60, %60 : vector<64x32xf32>
      %cst_31 = arith.constant dense<0.000000e+00> : vector<64xf32>
      %62 = vector.multi_reduction <add>, %61, %cst_31 [1] : vector<64x32xf32> to vector<64xf32>
      %63 = vector.shape_cast %62 : vector<64xf32> to vector<64x1xf32>
      %cst_32 = arith.constant 3.200000e+01 : f32
      %64 = vector.broadcast %cst_32 : f32 to vector<64x1xf32>
      %65 = arith.divf %63, %64 : vector<64x1xf32>
      %cst_33 = arith.constant 9.99999974E-6 : f32
      %66 = vector.broadcast %cst_33 : f32 to vector<64x1xf32>
      %67 = arith.addf %65, %66 : vector<64x1xf32>
      %68 = math.rsqrt %67 : vector<64x1xf32>
      %69 = vector.broadcast %68 : vector<64x1xf32> to vector<64x32xf32>
      %70 = arith.mulf %60, %69 : vector<64x32xf32>
      %c0_34 = arith.constant 0 : index
      %c0_35 = arith.constant 0 : index
      %71 = vector.load %arg3[%c0_34, %c0_35] : memref<64x16xf32, #tpu.memory_space<vmem>>, vector<64x16xf32>
      %c0_36 = arith.constant 0 : index
      %72 = memref.load %arg1[%c0_36] : memref<1xf32, #tpu.memory_space<smem>>
      %cst_37 = arith.constant 0.176776692 : f32
      %73 = vector.broadcast %cst_37 : f32 to vector<64x32xf32>
      %74 = arith.mulf %70, %73 : vector<64x32xf32>
      %75 = vector.broadcast %72 : f32 to vector<64x16xf32>
      %76 = arith.mulf %71, %75 : vector<64x16xf32>
      %77 = tpu.concatenate %74, %76 in 1 : vector<64x32xf32>, vector<64x16xf32> -> vector<64x48xf32>
      %78 = arith.truncf %77 : vector<64x48xf32> to vector<64x48xbf16>
      %c0_38 = arith.constant 0 : index
      %c0_39 = arith.constant 0 : index
      %79 = vector.load %arg9[%c0_38, %c0_39] : memref<64x48xbf16, #tpu.memory_space<vmem>>, vector<64x48xbf16>
      tpu.vector_store %arg9[%c0_38, %c0_39], %78 {strides = array<i32>} : memref<64x48xbf16, #tpu.memory_space<vmem>>, vector<64x48xbf16>,
      %80 = tpu.concatenate %70, %71 in 1 : vector<64x32xf32>, vector<64x16xf32> -> vector<64x48xf32>
      %81 = arith.truncf %80 : vector<64x48xf32> to vector<64x48xbf16>
      %c0_40 = arith.constant 0 : index
      %c0_41 = arith.constant 0 : index
      %82 = vector.load %arg10[%c0_40, %c0_41] : memref<64x48xbf16, #tpu.memory_space<vmem>>, vector<64x48xbf16>
      tpu.vector_store %arg10[%c0_40, %c0_41], %81 {strides = array<i32>} : memref<64x48xbf16, #tpu.memory_space<vmem>>, vector<64x48xbf16>,
      %cst_42 = arith.constant 0.000000e+00 : f32
      %83 = vector.broadcast %cst_42 : f32 to vector<64x66xf32>
      %c0_43 = arith.constant 0 : index
      %c0_44 = arith.constant 0 : index
      %84 = vector.load %arg11[%c0_43, %c0_44] : memref<64x66xf32, #tpu.memory_space<vmem>>, vector<64x66xf32>
      tpu.vector_store %arg11[%c0_43, %c0_44], %83 {strides = array<i32>} : memref<64x66xf32, #tpu.memory_space<vmem>>, vector<64x66xf32>,
    } else {
    }
    %c0 = arith.constant 0 : index
    %c0_1 = arith.constant 0 : index
    %3 = vector.load %arg4[%c0, %c0_1] : memref<128x1xi32, #tpu.memory_space<vmem>>, vector<128x1xi32>
    %c0_2 = arith.constant 0 : index
    %c0_3 = arith.constant 0 : index
    %4 = vector.load %arg6[%c0_2, %c0_3] : memref<128x1xi32, #tpu.memory_space<vmem>>, vector<128x1xi32>
    %c0_4 = arith.constant 0 : index
    %c0_5 = arith.constant 0 : index
    %5 = vector.load %arg5[%c0_4, %c0_5] : memref<1x128xi32, #tpu.memory_space<vmem>>, vector<1x128xi32>
    %6 = tpu.iota {dimensions = array<i32: 1>} : vector<128x64xi32>
    %7 = tpu.iota {dimensions = array<i32: 0>} : vector<64x128xi32>
    %8 = vector.broadcast %3 : vector<128x1xi32> to vector<128x64xi32>
    %9 = arith.cmpi eq, %8, %6 : vector<128x64xi32>
    %cst = arith.constant 1.000000e+00 : f32
    %cst_6 = arith.constant 0.000000e+00 : f32
    %10 = vector.broadcast %cst : f32 to vector<128x64xf32>
    %11 = vector.broadcast %cst_6 : f32 to vector<128x64xf32>
    %12 = arith.select %9, %10, %11 : vector<128x64xi1>, vector<128x64xf32>
    %13 = arith.truncf %12 : vector<128x64xf32> to vector<128x64xbf16>
    %14 = vector.broadcast %4 : vector<128x1xi32> to vector<128x64xi32>
    %15 = arith.cmpi eq, %14, %6 : vector<128x64xi32>
    %cst_7 = arith.constant 1.000000e+00 : f32
    %cst_8 = arith.constant 0.000000e+00 : f32
    %16 = vector.broadcast %cst_7 : f32 to vector<128x64xf32>
    %17 = vector.broadcast %cst_8 : f32 to vector<128x64xf32>
    %18 = arith.select %15, %16, %17 : vector<128x64xi1>, vector<128x64xf32>
    %19 = arith.truncf %18 : vector<128x64xf32> to vector<128x64xbf16>
    %20 = vector.broadcast %5 : vector<1x128xi32> to vector<64x128xi32>
    %21 = arith.cmpi eq, %20, %7 : vector<64x128xi32>
    %cst_9 = arith.constant 1.000000e+00 : f32
    %cst_10 = arith.constant 0.000000e+00 : f32
    %22 = vector.broadcast %cst_9 : f32 to vector<64x128xf32>
    %23 = vector.broadcast %cst_10 : f32 to vector<64x128xf32>
    %24 = arith.select %21, %22, %23 : vector<64x128xi1>, vector<64x128xf32>
    %25 = arith.truncf %24 : vector<64x128xf32> to vector<64x128xbf16>
    %c0_11 = arith.constant 0 : index
    %c0_12 = arith.constant 0 : index
    %26 = vector.load %arg9[%c0_11, %c0_12] : memref<64x48xbf16, #tpu.memory_space<vmem>>, vector<64x48xbf16>
    %cst_13 = arith.constant dense<0.000000e+00> : vector<128x48xf32>
    %27 = tpu.matmul %13, %26, %cst_13 {dimension_numbers = #tpu.dot_dimension_numbers<[1], [0], [0], [1], [0, 0, 1, 1], [], []>} : vector<128x64xbf16>, vector<64x48xbf16>, vector<128x48xf32> -> vector<128x48xf32>
    %c0_14 = arith.constant 0 : index
    %c0_15 = arith.constant 0 : index
    %28 = vector.load %arg10[%c0_14, %c0_15] : memref<64x48xbf16, #tpu.memory_space<vmem>>, vector<64x48xbf16>
    %cst_16 = arith.constant dense<0.000000e+00> : vector<128x48xf32>
    %29 = tpu.matmul %19, %28, %cst_16 {dimension_numbers = #tpu.dot_dimension_numbers<[1], [0], [0], [1], [0, 0, 1, 1], [], []>} : vector<128x64xbf16>, vector<64x48xbf16>, vector<128x48xf32> -> vector<128x48xf32>
    %30 = arith.mulf %27, %29 : vector<128x48xf32>
    %cst_17 = arith.constant dense<0.000000e+00> : vector<128xf32>
    %31 = vector.multi_reduction <add>, %30, %cst_17 [1] : vector<128x48xf32> to vector<128xf32>
    %32 = vector.shape_cast %31 : vector<128xf32> to vector<128x1xf32>
    %c0_18 = arith.constant 0 : index
    %c0_19 = arith.constant 0 : index
    %33 = vector.load %arg7[%c0_18, %c0_19] : memref<128x1xf32, #tpu.memory_space<vmem>>, vector<128x1xf32>
    %34 = tpu.concatenate %32, %33 in 1 : vector<128x1xf32>, vector<128x1xf32> -> vector<128x2xf32>
    %35 = math.exp %34 : vector<128x2xf32>
    %cst_20 = arith.constant 5.000000e+00 : f32
    %36 = vector.broadcast %cst_20 : f32 to vector<128x2xf32>
    %37 = arith.minimumf %35, %36 : vector<128x2xf32>
    %38 = vector.extract_strided_slice %29 {offsets = [0, 0], sizes = [128, 32], strides = [1, 1]} : vector<128x48xf32> to vector<128x32xf32>
    %39 = vector.extract_strided_slice %37 {offsets = [0, 0], sizes = [128, 1], strides = [1, 1]} : vector<128x2xf32> to vector<128x1xf32>
    %40 = vector.broadcast %39 : vector<128x1xf32> to vector<128x32xf32>
    %41 = arith.mulf %40, %38 : vector<128x32xf32>
    %42 = vector.extract_strided_slice %37 {offsets = [0, 1], sizes = [128, 1], strides = [1, 1]} : vector<128x2xf32> to vector<128x1xf32>
    %43 = vector.broadcast %42 : vector<128x1xf32> to vector<128x32xf32>
    %44 = arith.mulf %43, %38 : vector<128x32xf32>
    %45 = tpu.concatenate %41, %44, %37 in 1 : vector<128x32xf32>, vector<128x32xf32>, vector<128x2xf32> -> vector<128x66xf32>
    %c0_21 = arith.constant 0 : index
    %c0_22 = arith.constant 0 : index
    %46 = vector.load %arg11[%c0_21, %c0_22] : memref<64x66xf32, #tpu.memory_space<vmem>>, vector<64x66xf32>
    %47 = arith.truncf %45 : vector<128x66xf32> to vector<128x66xbf16>
    %cst_23 = arith.constant dense<0.000000e+00> : vector<64x66xf32>
    %48 = tpu.matmul %25, %47, %cst_23 {dimension_numbers = #tpu.dot_dimension_numbers<[1], [0], [0], [1], [0, 0, 1, 1], [], []>} : vector<64x128xbf16>, vector<128x66xbf16>, vector<64x66xf32> -> vector<64x66xf32>
    %49 = arith.addf %46, %48 : vector<64x66xf32>
    %c0_24 = arith.constant 0 : index
    %c0_25 = arith.constant 0 : index
    %50 = vector.load %arg11[%c0_24, %c0_25] : memref<64x66xf32, #tpu.memory_space<vmem>>, vector<64x66xf32>
    tpu.vector_store %arg11[%c0_24, %c0_25], %49 {strides = array<i32>} : memref<64x66xf32, #tpu.memory_space<vmem>>, vector<64x66xf32>,
    %c1_i32 = arith.constant 1 : i32
    %51 = arith.cmpi eq, %arg0, %c1_i32 : i32
    %52 = arith.extui %51 : i1 to i32
    %c0_i32_26 = arith.constant 0 : i32
    %53 = arith.cmpi ne, %52, %c0_i32_26 : i32
    scf.if %53 {
      %c0_27 = arith.constant 0 : index
      %c0_28 = arith.constant 0 : index
      %54 = vector.load %arg11[%c0_27, %c0_28] : memref<64x66xf32, #tpu.memory_space<vmem>>, vector<64x66xf32>
      %55 = vector.extract_strided_slice %54 {offsets = [0, 64], sizes = [64, 2], strides = [1, 1]} : vector<64x66xf32> to vector<64x2xf32>
      %cst_29 = arith.constant 0.000000e+00 : f32
      %56 = vector.broadcast %cst_29 : f32 to vector<64x2xf32>
      %57 = arith.cmpf oeq, %55, %56 : vector<64x2xf32>
      %cst_30 = arith.constant 1.000000e+00 : f32
      %58 = vector.broadcast %cst_30 : f32 to vector<64x2xf32>
      %59 = arith.select %57, %58, %55 : vector<64x2xi1>, vector<64x2xf32>
      %60 = tpu.reciprocal %59 {approx = true} : vector<64x2xf32> -> vector<64x2xf32>
      %61 = vector.extract_strided_slice %54 {offsets = [0, 0], sizes = [64, 32], strides = [1, 1]} : vector<64x66xf32> to vector<64x32xf32>
      %62 = vector.extract_strided_slice %60 {offsets = [0, 0], sizes = [64, 1], strides = [1, 1]} : vector<64x2xf32> to vector<64x1xf32>
      %63 = vector.broadcast %62 : vector<64x1xf32> to vector<64x32xf32>
      %64 = arith.mulf %61, %63 : vector<64x32xf32>
      %65 = vector.extract_strided_slice %54 {offsets = [0, 32], sizes = [64, 32], strides = [1, 1]} : vector<64x66xf32> to vector<64x32xf32>
      %66 = vector.extract_strided_slice %60 {offsets = [0, 1], sizes = [64, 1], strides = [1, 1]} : vector<64x2xf32> to vector<64x1xf32>
      %67 = vector.broadcast %66 : vector<64x1xf32> to vector<64x32xf32>
      %68 = arith.mulf %65, %67 : vector<64x32xf32>
      %69 = arith.addf %64, %68 : vector<64x32xf32>
      %cst_31 = arith.constant 5.000000e-01 : f32
      %70 = vector.broadcast %cst_31 : f32 to vector<64x32xf32>
      %71 = arith.mulf %70, %69 : vector<64x32xf32>
      %c0_32 = arith.constant 0 : index
      %c0_33 = arith.constant 0 : index
      %72 = vector.load %arg8[%c0_32, %c0_33] : memref<64x32xf32, #tpu.memory_space<vmem>>, vector<64x32xf32>
      tpu.vector_store %arg8[%c0_32, %c0_33], %71 {strides = array<i32>} : memref<64x32xf32, #tpu.memory_space<vmem>>, vector<64x32xf32>,
    } else {
    }
    return
  }
  func.func @transform_0(%arg0: i32, %arg1: memref<1xf32, #tpu.memory_space<smem>>) -> (i32, i32) {
    %c0_i32 = arith.constant 0 : i32
    %c0_i32_0 = arith.constant 0 : i32
    %c0_i32_1 = arith.constant 0 : i32
    return %c0_i32, %c0_i32_0 : i32, i32
  }
  func.func @transform_1(%arg0: i32, %arg1: memref<1xf32, #tpu.memory_space<smem>>) -> (i32, i32) {
    %c0_i32 = arith.constant 0 : i32
    %c0_i32_0 = arith.constant 0 : i32
    %c0_i32_1 = arith.constant 0 : i32
    return %c0_i32, %c0_i32_0 : i32, i32
  }
  func.func @transform_2(%arg0: i32, %arg1: memref<1xf32, #tpu.memory_space<smem>>) -> (i32, i32) {
    %c0_i32 = arith.constant 0 : i32
    %c0_i32_0 = arith.constant 0 : i32
    return %arg0, %c0_i32 : i32, i32
  }
  func.func @transform_3(%arg0: i32, %arg1: memref<1xf32, #tpu.memory_space<smem>>) -> (i32, i32) {
    %c0_i32 = arith.constant 0 : i32
    %c0_i32_0 = arith.constant 0 : i32
    return %c0_i32, %arg0 : i32, i32
  }
  func.func @transform_4(%arg0: i32, %arg1: memref<1xf32, #tpu.memory_space<smem>>) -> (i32, i32) {
    %c0_i32 = arith.constant 0 : i32
    %c0_i32_0 = arith.constant 0 : i32
    return %arg0, %c0_i32 : i32, i32
  }
  func.func @transform_5(%arg0: i32, %arg1: memref<1xf32, #tpu.memory_space<smem>>) -> (i32, i32) {
    %c0_i32 = arith.constant 0 : i32
    %c0_i32_0 = arith.constant 0 : i32
    return %arg0, %c0_i32 : i32, i32
  }
  func.func @transform_6(%arg0: i32, %arg1: memref<1xf32, #tpu.memory_space<smem>>) -> (i32, i32) {
    %c0_i32 = arith.constant 0 : i32
    %c0_i32_0 = arith.constant 0 : i32
    %c0_i32_1 = arith.constant 0 : i32
    return %c0_i32, %c0_i32_0 : i32, i32
  }
}

</mosaic_0001>

<bundles_post_ra>
// kernel: tpu_custom_call.1
= control target key start
LH: loop header
LB: loop body
LE: loop exit
PB: predicated region body
PF: predicated region fallthrough
CT: control target
= control target key end

     0   :  { %s2357_s26 = smov 0   ;;  %s3088_s0 = inlined_call_operand.<no memory space> [shape: f32[1], index: 0, kind: input, shape index: {}]   ;;  %s3089_s1 = inlined_call_operand.vmem [shape: f32[64,32], index: 1, kind: input, shape index: {}]   ;;  %s3090_s2 = inlined_call_operand.vmem [shape: f32[64,16], index: 2, kind: input, shape index: {}]   ;;  %s3091_s3 = inlined_call_operand.vmem [shape: s32[256,1], index: 3, kind: input, shape index: {}]   ;;  %s3092_s4 = inlined_call_operand.vmem [shape: s32[1,256], index: 4, kind: input, shape index: {}]   ;;  %s3093_s5 = inlined_call_operand.vmem [shape: s32[256,1], index: 5, kind: input, shape index: {}]   ;;  %s3094_s6 = inlined_call_operand.vmem [shape: f32[256,1], index: 6, kind: input, shape index: {}]   ;;  %s3095_s7 = inlined_call_operand.vmem [shape: f32[64,32], index: 7, kind: output, shape index: {}]  }
   0x1   :  { %12 = sst [smem:[#allocation6]] %s3088_s0 }
   0x2 LB: > { %s2363_s27 = sadd.s32 4294967295, %s2300_s26   ;;  %p1918_p0 = scmp.ge.s32.totalorder %s2300_s26, 1  ;;  %s2300_s26 = sphi %s2357_s26, %s18_s26  }
   0x3   : > { %p240_p1 = scmp.lt.s32.totalorder %s2300_s26, 3 }
   0x5   : > { %p241_p2 = pnand %p1918_p0, %p240_p1 }
   0x6   : > { %s1919_s0 = sshll.u32 (!%p241_p2), %s2363_s27, 4  ;;  %p284_p3 = scmp.lt.s32.totalorder (!%p241_p2), %s2363_s27, 1 }
   0x7   : > { %244 = sbr.rel (%p241_p2) target bundleno = 1738 (0x6ca), region = 44  ;;  %p279_p4 = scmp.lt.s32.totalorder (!%p241_p2), %s1919_s0, 31 }
   0x8   : > { %p1925_p5 = scmp.ne.s32.totalorder (!%p241_p2), %s2363_s27, 0 }
   0xe   : > { %s2370_s28 = scalar_select %p284_p3, %s2363_s27, 1 }
   0xf   : > { %s3101_s0 = smov (!%p279_p4, %s1919_s0), 31  ;;  %303 = sbr.rel (%p1925_p5) target bundleno = 397 (0x18d), region = 48 }
  0x10   : > { %s286_s8 = scalar_lea.vmem %s3092_s4, %s2370_s28  ;;  %s1920_s9 = sshll.u32 %s3101_s0, 3  ;;  %v304_v0 = vld [vmem:[%s3089_s1] sm:$0xff] (!%p1925_p5)  ;;  %vm312_vm0 = vcmask (!%p1925_p5), 261120   ;;  %v306_v1 = vld [vmem:[%s3089_s1 + $0x10] sm:$0xff] (!%p1925_p5)  ;;  %v2401_v2 = vld [vmem:[%s3089_s1 + $0x8] sm:$0xff] (!%p1925_p5)  ;;  %vm541_vm1 = vcmask (!%p1925_p5), 539648  }
  0x11   : > { %s2379_s12 = scalar_lea.vmem %s3091_s3, %s1920_s9  ;;  %s2384_s15 = scalar_lea.vmem %s3093_s5, %s1920_s9  ;;  %v313_v3 = vsel (!%p1925_p5), %vm312_vm0, %v304_v0, 0.0  ;;  %v319_v4 = vsel (!%p1925_p5), %vm312_vm0, %v306_v1, 0.0  ;;  %v307_v5 = vld [vmem:[%s3089_s1 + $0x18] sm:$0xff] (!%p1925_p5)  ;;  %v316_v6 = vsel (!%p1925_p5), %vm312_vm0, %v2401_v2, 0.0  ;;  %v2414_v8 = vld [vmem:[%s3089_s1 + $0x20] sm:$0xff] (!%p1925_p5)  ;;  %v2419_v9 = vld [vmem:[%s3089_s1 + $0x28] sm:$0xff] (!%p1925_p5) }
  0x12   : > { %s2389_s18 = scalar_lea.vmem %s3094_s6, %s1920_s9  ;;  %314 = vadd.xlane.f32.xlu0 (!%p1925_p5), %v313_v3  ;;  %320 = vadd.xlane.f32.xlu1 (!%p1925_p5), %v319_v4  ;;  %v322_v7 = vsel (!%p1925_p5), %vm312_vm0, %v307_v5, 0.0  ;;  %v325_v10 = vsel (!%p1925_p5), %vm312_vm0, %v2414_v8, 0.0  ;;  %v328_v11 = vsel (!%p1925_p5), %vm312_vm0, %v2419_v9, 0.0  ;;  %v2428_v12 = vld [vmem:[%s3089_s1 + $0x30] sm:$0xff] (!%p1925_p5)  ;;  %v2433_v13 = vld [vmem:[%s3089_s1 + $0x38] sm:$0xff] (!%p1925_p5)  ;;  %s426_s17 = sld [smem:[#allocation6]] (!%p1925_p5) }
  0x13   : > { %v331_v14 = vsel (!%p1925_p5), %vm312_vm0, %v2428_v12, 0.0  ;;  %v334_v15 = vsel (!%p1925_p5), %vm312_vm0, %v2433_v13, 0.0  ;;  %v2442_v16 = vld [vmem:[%s3090_s2 + $0x10] sm:$0xff] (!%p1925_p5)  ;;  %v2447_v17 = vld [vmem:[%s3090_s2 + $0x18] sm:$0xff] (!%p1925_p5)  ;;  %v2454_v21 = vld [vmem:[%s3090_s2 + $0x20] sm:$0xff] (!%p1925_p5)  ;;  %vm488_vm2 = vcmask (!%p1925_p5), 392192  }
  0x14   : > { %v2459_v22 = vld [vmem:[%s3090_s2 + $0x28] sm:$0xff] (!%p1925_p5)  ;;  %v2464_v23 = vld [vmem:[%s3090_s2] sm:$0xff] (!%p1925_p5)  ;;  %v2476_v28 = vld [vmem:[%s3090_s2 + $0x30] sm:$0xff] (!%p1925_p5)  ;;  %v2123_v37 = vpack.i.bf16 (!%p1925_p5), %v2447_v17, %v2442_v16 }
  0x15   : > { %v2469_v24 = vld [vmem:[%s3090_s2 + $0x8] sm:$0xff] (!%p1925_p5)  ;;  %v2481_v29 = vld [vmem:[%s3090_s2 + $0x38] sm:$0xff] (!%p1925_p5)  ;;  %v2128_v39 = vpack.i.bf16 (!%p1925_p5), %v2459_v22, %v2454_v21 }
  0x16   : > { %317 = vadd.xlane.f32.xlu0 %v316_v6  ;;  %323 = vadd.xlane.f32.xlu1 %v322_v7  ;;  %v2118_v38 = vpack.i.bf16 %v2469_v24, %v2464_v23 }
  0x18   : > { %v435_v18 = vstv %s426_s17  ;;  %s2302_s17 = smov 32  }
  0x19   : > { %v438_v19 = vmul.f32 %v435_v18, %v2442_v16  ;;  %v439_v20 = vmul.f32 %v435_v18, %v2447_v17  ;;  %v440_v26 = vmul.f32 %v435_v18, %v2454_v21  ;;  %v441_v27 = vmul.f32 %v435_v18, %v2459_v22 }
  0x1a   : > { %326 = vadd.xlane.f32.xlu0 %v325_v10  ;;  %329 = vadd.xlane.f32.xlu1 %v328_v11  ;;  %v436_v30 = vmul.f32 %v435_v18, %v2464_v23  ;;  %v437_v31 = vmul.f32 %v435_v18, %v2469_v24  ;;  %v442_v33 = vmul.f32 %v435_v18, %v2476_v28 }
  0x1b   : > { %v2103_v25 = vpack.i.bf16 %v439_v20, %v438_v19  ;;  %v2108_v32 = vpack.i.bf16 %v441_v27, %v440_v26  ;;  %v443_v34 = vmul.f32 %v435_v18, %v2481_v29  ;;  %v2133_v17 = vpack.i.bf16 %v2481_v29, %v2476_v28 }
  0x1c   : > { %v2098_v35 = vpack.i.bf16 %v437_v31, %v436_v30  ;;  %v2303_v18 = vmov 0.0  }
  0x1d   : > { %v2113_v36 = vpack.i.bf16 %v443_v34, %v442_v33  ;;  %542 = vst.msk [vmem:[#allocation4] sm:$0xff] %vm541_vm1, %v2303_v18  ;;  %543 = vst.msk [vmem:[#allocation4 + $0x8] sm:$0xff] %vm541_vm1, %v2303_v18 }
  0x1e   : > { %332 = vadd.xlane.f32.xlu0 %v331_v14  ;;  %335 = vadd.xlane.f32.xlu1 %v334_v15  ;;  %544 = vst.msk [vmem:[#allocation4 + $0x10] sm:$0xff] %vm541_vm1, %v2303_v18  ;;  %545 = vst.msk [vmem:[#allocation4 + $0x18] sm:$0xff] %vm541_vm1, %v2303_v18 }
  0x1f   : > { %546 = vst.msk [vmem:[#allocation4 + $0x20] sm:$0xff] %vm541_vm1, %v2303_v18  ;;  %547 = vst.msk [vmem:[#allocation4 + $0x28] sm:$0xff] %vm541_vm1, %v2303_v18 }
  0x20   : > { %548 = vst.msk [vmem:[#allocation4 + $0x30] sm:$0xff] %vm541_vm1, %v2303_v18  ;;  %549 = vst.msk [vmem:[#allocation4 + $0x38] sm:$0xff] %vm541_vm1, %v2303_v18 }
  0x2f   : > { %2104 = vrot.lane.b32.xlu1 %v2103_v25, %s2302_s17 }
  0x33   : > { %2109 = vrot.lane.b32.xlu1 %v2108_v32, %s2302_s17 }
  0x34   : > { %2099 = vrot.lane.b32.xlu0 %v2098_v35, %s2302_s17 }
  0x37   : > { %2114 = vrot.lane.b32.xlu1 %v2113_v36, %s2302_s17 }
  0x9f   : > { %v315_v40 = vpop.xlane.xlu0 %314  ;;  %v321_v41 = vpop.xlane.xlu1 %320 }
  0xa0   : > { %v338_v42 = vmul.f32 0.03125, %v315_v40  ;;  %v340_v43 = vmul.f32 0.03125, %v321_v41 }
  0xa2   : > { %v2497_v44 = vsub.f32 %v304_v0, %v338_v42  ;;  %v2499_v45 = vsub.f32 %v306_v1, %v340_v43 }
  0xa3   : > { %v318_v46 = vpop.xlane.xlu0 %317  ;;  %v324_v47 = vpop.xlane.xlu1 %323 }
  0xa4   : > { %v339_v48 = vmul.f32 0.03125, %v318_v46  ;;  %v341_v49 = vmul.f32 0.03125, %v324_v47  ;;  %v354_v50 = vmul.f32 %v2497_v44, %v2497_v44  ;;  %v356_v51 = vmul.f32 %v2499_v45, %v2499_v45 }
  0xa6   : > { %v2506_v52 = vsub.f32 %v2401_v2, %v339_v48  ;;  %v2508_v53 = vsub.f32 %v307_v5, %v341_v49  ;;  %v362_v54 = vsel %vm312_vm0, %v354_v50, 0.0  ;;  %v368_v57 = vsel %vm312_vm0, %v356_v51, 0.0 }
  0xa7   : > { %363 = vadd.xlane.f32.xlu0 %v362_v54  ;;  %v327_v55 = vpop.xlane.xlu0 %326  ;;  %v330_v56 = vpop.xlane.xlu1 %329 }
  0xa8   : > { %v342_v58 = vmul.f32 0.03125, %v327_v55  ;;  %v343_v59 = vmul.f32 0.03125, %v330_v56  ;;  %v355_v60 = vmul.f32 %v2506_v52, %v2506_v52  ;;  %v357_v61 = vmul.f32 %v2508_v53, %v2508_v53 }
  0xaa   : > { %v2517_v62 = vsub.f32 %v2414_v8, %v342_v58  ;;  %v2520_v63 = vsub.f32 %v2419_v9, %v343_v59  ;;  %v365_v0 = vsel %vm312_vm0, %v355_v60, 0.0  ;;  %v371_v3 = vsel %vm312_vm0, %v357_v61, 0.0 }
  0xab   : > { %369 = vadd.xlane.f32.xlu0 %v368_v57  ;;  %366 = vadd.xlane.f32.xlu1 %v365_v0  ;;  %v333_v1 = vpop.xlane.xlu0 %332  ;;  %v336_v11 = vpop.xlane.xlu1 %335 }
  0xac   : > { %v344_v2 = vmul.f32 0.03125, %v333_v1  ;;  %v358_v4 = vmul.f32 %v2517_v62, %v2517_v62  ;;  %v359_v5 = vmul.f32 %v2520_v63, %v2520_v63 }
  0xae   : > { %v2529_v6 = vsub.f32 %v2428_v12, %v344_v2  ;;  %v374_v7 = vsel %vm312_vm0, %v358_v4, 0.0  ;;  %v377_v8 = vsel %vm312_vm0, %v359_v5, 0.0  ;;  %v345_v12 = vmul.f32 0.03125, %v336_v11 }
  0xaf   : > { %372 = vadd.xlane.f32.xlu1 %v371_v3  ;;  %375 = vadd.xlane.f32.xlu0 %v374_v7  ;;  %v2100_v20 = vpop.permute.xlu0 %2099 }
  0xb0   : > { %v360_v9 = vmul.f32 %v2529_v6, %v2529_v6  ;;  %v2540_v14 = vsub.f32 %v2433_v13, %v345_v12  ;;  %v2548_v13 = vpop.permute.xlu1 %2104  ;;  %v2102_v55 = vunpack.i.h.bf16 %v2100_v20  ;;  %v2101_v56 = vunpack.i.l.bf16 %v2100_v20 }
  0xb1   : > { %v2107_v61 = vunpack.i.h.bf16 %v2548_v13 }
  0xb2   : > { %v380_v10 = vsel %vm312_vm0, %v360_v9, 0.0  ;;  %v361_v15 = vmul.f32 %v2540_v14, %v2540_v14 }
  0xb3   : > { %378 = vadd.xlane.f32.xlu1 %v377_v8  ;;  %381 = vadd.xlane.f32.xlu0 %v380_v10  ;;  %v2106_v8 = vunpack.i.l.bf16 %v2548_v13 }
  0xb4   : > { %v383_v16 = vsel %vm312_vm0, %v361_v15, 0.0  ;;  %v2550_v19 = vpop.permute.xlu1 %2109 }
  0xb8   : > { %v2552_v21 = vpop.permute.xlu1 %2114 }
  0xc4   : > { %2124 = vrot.lane.b32.xlu1 %v2123_v37, %s2302_s17 }
  0xc9   : > { %2119 = vrot.lane.b32.xlu0 %v2118_v38, %s2302_s17 }
  0xcd   : > { %2129 = vrot.lane.b32.xlu0 %v2128_v39, %s2302_s17 }
  0xe8   : > { %384 = vadd.xlane.f32.xlu1 %v383_v16 }
  0xf9   : > { %2134 = vrot.lane.b32.xlu1 %v2133_v17, %s2302_s17 }
 0x134   : > { %v364_v22 = vpop.xlane.xlu0 %363 }
 0x135   : > { %v386_v23 = vmul.f32 0.03125, %v364_v22 }
 0x137   : > { %v394_v24 = vadd.f32 1e-05, %v386_v23 }
 0x138   : > { %v367_v25 = vpop.xlane.xlu1 %366  ;;  %v370_v26 = vpop.xlane.xlu0 %369 }
 0x139   : > { %2138 = vrsqrt.f32 %v394_v24  ;;  %v387_v27 = vmul.f32 0.03125, %v367_v25  ;;  %v388_v28 = vmul.f32 0.03125, %v370_v26  ;;  %v2111_v25 = vunpack.i.l.bf16 %v2550_v19 }
 0x13b   : > { %v395_v29 = vadd.f32 1e-05, %v387_v27  ;;  %v396_v30 = vadd.f32 1e-05, %v388_v28 }
 0x13c   : > { %v373_v31 = vpop.xlane.xlu1 %372  ;;  %v376_v32 = vpop.xlane.xlu0 %375 }
 0x13d   : > { %2140 = vrsqrt.f32 %v395_v29  ;;  %v389_v33 = vmul.f32 0.03125, %v373_v31  ;;  %v390_v34 = vmul.f32 0.03125, %v376_v32 }
 0x13e   : > { %2142 = vrsqrt.f32 %v396_v30 }
 0x13f   : > { %v397_v35 = vadd.f32 1e-05, %v389_v33  ;;  %v398_v36 = vadd.f32 1e-05, %v390_v34 }
 0x140   : > { %v379_v37 = vpop.xlane.xlu1 %378  ;;  %v2554_v38 = vpop.xlane.xlu0 %381 }
 0x141   : > { %2144 = vrsqrt.f32 %v397_v35  ;;  %v391_v39 = vmul.f32 0.03125, %v379_v37  ;;  %v392_v32 = vmul.f32 0.03125, %v2554_v38  ;;  %v2116_v38 = vunpack.i.l.bf16 %v2552_v21 }
 0x142   : > { %2146 = vrsqrt.f32 %v398_v36 }
 0x143   : > { %v2139_v40 = vpop.eup %2138  ;;  %v399_v41 = vadd.f32 1e-05, %v391_v39 }
 0x144   : > { %v410_v42 = vmul.f32 %v2139_v40, %v2497_v44  ;;  %v2120_v43 = vpop.permute.xlu0 %2119  ;;  %v2125_v50 = vpop.permute.xlu1 %2124 }
 0x145   : > { %2148 = vrsqrt.f32 %v399_v41  ;;  %v2122_v46 = vunpack.i.h.bf16 %v2120_v43  ;;  %v2121_v47 = vunpack.i.l.bf16 %v2120_v43  ;;  %v2127_v0 = vunpack.i.h.bf16 %v2125_v50 }
 0x146   : > { %v427_v54 = vmul.f32 0.17677669, %v410_v42  ;;  %v2126_v1 = vunpack.i.l.bf16 %v2125_v50 }
 0x147   : > { %v2141_v48 = vpop.eup %2140  ;;  %v525_v44 = vsel %vm312_vm0, %v410_v42, %v2121_v47  ;;  %v2117_v47 = vunpack.i.h.bf16 %v2552_v21 }
 0x148   : > { %v2143_v49 = vpop.eup %2142  ;;  %v411_v51 = vmul.f32 %v2141_v48, %v2506_v52  ;;  %v2130_v3 = vpop.permute.xlu0 %2129  ;;  %v476_v7 = vsel %vm312_vm0, %v427_v54, %v2101_v56 }
 0x149   : > { %v412_v57 = vmul.f32 %v2143_v49, %v2499_v45  ;;  %v2132_v11 = vunpack.i.h.bf16 %v2130_v3  ;;  %v2131_v17 = vunpack.i.l.bf16 %v2130_v3 }
 0x14a   : > { %v428_v58 = vmul.f32 0.17677669, %v411_v51  ;;  %v526_v59 = vsel %vm312_vm0, %v411_v51, %v2122_v46 }
 0x14b   : > { %v2145_v60 = vpop.eup %2144  ;;  %v533_v2 = vpack.c.bf16 %v526_v59, %v525_v44  ;;  %v429_v5 = vmul.f32 0.17677669, %v412_v57  ;;  %v527_v16 = vsel %vm312_vm0, %v412_v57, %v2126_v1 }
 0x14c   : > { %v2147_v4 = vpop.eup %2146  ;;  %v413_v52 = vmul.f32 %v2145_v60, %v2508_v53  ;;  %v477_v45 = vsel %vm312_vm0, %v428_v58, %v2102_v55 }
 0x14d   : > { %v484_v9 = vpack.c.bf16 %v477_v45, %v476_v7  ;;  %537 = vst.msk [vmem:[#allocation3] sm:$0xff] %vm488_vm2, %v533_v2  ;;  %v414_v10 = vmul.f32 %v2147_v4, %v2517_v62  ;;  %v478_v13 = vsel %vm312_vm0, %v429_v5, %v2106_v8  ;;  %v2112_v62 = vunpack.i.h.bf16 %v2550_v19 }
 0x14e   : > { %v430_v12 = vmul.f32 0.17677669, %v413_v52  ;;  %v528_v15 = vsel %vm312_vm0, %v413_v52, %v2127_v0  ;;  %v400_v19 = vadd.f32 1e-05, %v392_v32 }
 0x14f   : > { %v2149_v53 = vpop.eup %2148  ;;  %v534_v18 = vpack.c.bf16 %v528_v15, %v527_v16  ;;  %489 = vst.msk [vmem:[#allocation2] sm:$0xff] %vm488_vm2, %v484_v9  ;;  %v431_v23 = vmul.f32 0.17677669, %v414_v10  ;;  %v529_v28 = vsel %vm312_vm0, %v414_v10, %v2131_v17 }
 0x150   : > { %v479_v20 = vsel %vm312_vm0, %v430_v12, %v2107_v61  ;;  %v415_v22 = vmul.f32 %v2149_v53, %v2520_v63  ;;  %2150 = vrsqrt.f32 %v400_v19 }
 0x151   : > { %v485_v24 = vpack.c.bf16 %v479_v20, %v478_v13  ;;  %538 = vst.msk [vmem:[#allocation3 + $0x8] sm:$0xff] %vm488_vm2, %v534_v18  ;;  %v480_v30 = vsel %vm312_vm0, %v431_v23, %v2111_v25 }
 0x152   : > { %v432_v26 = vmul.f32 0.17677669, %v415_v22  ;;  %v530_v27 = vsel %vm312_vm0, %v415_v22, %v2132_v11 }
 0x153   : > { %490 = vst.msk [vmem:[#allocation2 + $0x8] sm:$0xff] %vm488_vm2, %v485_v24  ;;  %v535_v29 = vpack.c.bf16 %v530_v27, %v529_v28 }
 0x154   : > { %v481_v63 = vsel %vm312_vm0, %v432_v26, %v2112_v62 }
 0x155   : > { %v486_v31 = vpack.c.bf16 %v481_v63, %v480_v30  ;;  %539 = vst.msk [vmem:[#allocation3 + $0x10] sm:$0xff] %vm488_vm2, %v535_v29 }
 0x157   : > { %491 = vst.msk [vmem:[#allocation2 + $0x10] sm:$0xff] %vm488_vm2, %v486_v31 }
 0x15a   : > { %v2151_v36 = vpop.eup %2150 }
 0x15b   : > { %v416_v39 = vmul.f32 %v2151_v36, %v2529_v6 }
 0x15d   : > { %v433_v46 = vmul.f32 0.17677669, %v416_v39 }
 0x15f   : > { %v482_v6 = vsel %vm312_vm0, %v433_v46, %v2116_v38 }
 0x175   : > { %v385_v33 = vpop.xlane.xlu1 %384 }
 0x176   : > { %v393_v34 = vmul.f32 0.03125, %v385_v33 }
 0x178   : > { %v401_v35 = vadd.f32 1e-05, %v393_v34 }
 0x179   : > { %v2135_v37 = vpop.permute.xlu1 %2134 }
 0x17a   : > { %2152 = vrsqrt.f32 %v401_v35  ;;  %v2137_v40 = vunpack.i.h.bf16 %v2135_v37  ;;  %v2136_v41 = vunpack.i.l.bf16 %v2135_v37 }
 0x17c   : > { %v531_v50 = vsel %vm312_vm0, %v416_v39, %v2136_v41 }
 0x184   : > { %v2153_v42 = vpop.eup %2152 }
 0x185   : > { %v417_v43 = vmul.f32 %v2153_v42, %v2540_v14 }
 0x187   : > { %v434_v48 = vmul.f32 0.17677669, %v417_v43  ;;  %v532_v49 = vsel %vm312_vm0, %v417_v43, %v2137_v40 }
 0x188   : > { %v536_v51 = vpack.c.bf16 %v532_v49, %v531_v50 }
 0x189   : > { %v483_v54 = vsel %vm312_vm0, %v434_v48, %v2117_v47 }
 0x18a   : > { %v487_v55 = vpack.c.bf16 %v483_v54, %v482_v6  ;;  %540 = vst.msk [vmem:[#allocation3 + $0x18] sm:$0xff] %vm488_vm2, %v536_v51 }
 0x18c   : > { %492 = vst.msk [vmem:[#allocation2 + $0x18] sm:$0xff] %vm488_vm2, %v487_v55 }
 0x18d PF: > { %v566_v14 = vld [vmem:[%s2384_s15] sm:$0xff]  ;;  %v2304_v56 = vmov 0   ;;  %v567_v57 = vld [vmem:[%s2384_s15 + $0x8] sm:$0xff]  ;;  %v553_v59 = vld [vmem:[%s2379_s12 + $0x18] sm:$0xff]  ;;  %s2305_s19 = smov 1   ;;  %v583_v47 = vlaneseq  ;;  %vm798_vm7 = vcmask 523264  }
 0x18e   : > { %v550_v21 = vld [vmem:[%s2379_s12] sm:$0xff]  ;;  %2155 = vset.pattern.permute.xlu1 %v2304_v56  ;;  %2154 = vset.pattern.permute.xlu0 %v2304_v56  ;;  %v551_v58 = vld [vmem:[%s2379_s12 + $0x8] sm:$0xff]  ;;  %v552_v44 = vld [vmem:[%s2379_s12 + $0x10] sm:$0xff]  ;;  %v2306_v54 = vmov 0.0   ;;  %p1951_p6 = scmp.ne.s32.totalorder %s2363_s27, 1 }
 0x18f   : > { %683 = vperm.xlu1 %2155, %v566_v14   ;;  %595 = vperm.xlu0 %2154, %v550_v21   ;;  %v569_v60 = vld [vmem:[%s2384_s15 + $0x18] sm:$0xff]  ;;  %v794_v61 = vld [vmem:[#allocation2] sm:$0xff]  ;;  %v568_v0 = vld [vmem:[%s2384_s15 + $0x10] sm:$0xff]  ;;  %v2658_v38 = vand.u32 127, %v583_v47  ;;  %s2313_s27 = smov (!%p1951_p6), 96  }
 0x190   : > { %1990 = vmatprep.subr.bf16.mxu0 %v794_v61  ;;  %v795_v1 = vld [vmem:[#allocation2 + $0x8] sm:$0xff]  ;;  %v920_v2 = vld [vmem:[#allocation3] sm:$0xff]  ;;  %v796_v4 = vld [vmem:[#allocation2 + $0x10] sm:$0xff] }
 0x191   : > { %1991 = vmatpush3.bf16.msra.mxu0 %v794_v61  ;;  %2014 = vmatprep.subr.bf16.mxu1 %v920_v2  ;;  %v921_v3 = vld [vmem:[#allocation3 + $0x8] sm:$0xff]  ;;  %v554_v5 = vld [vmem:[%s2379_s12 + $0x20] sm:$0xff]  ;;  %v922_v7 = vld [vmem:[#allocation3 + $0x10] sm:$0xff] }
 0x192   : > { %1992 = vmatprep.subr.bf16.mxu0 %v795_v1  ;;  %2015 = vmatpush3.bf16.msra.mxu1 %v920_v2  ;;  %v555_v52 = vld [vmem:[%s2379_s12 + $0x28] sm:$0xff]  ;;  %v570_v9 = vld [vmem:[%s2384_s15 + $0x20] sm:$0xff]  ;;  %v923_v10 = vld [vmem:[#allocation3 + $0x18] sm:$0xff] }
 0x193   : > { %686 = vperm.xlu1 %2155, %v567_v57   ;;  %598 = vperm.xlu0 %2154, %v551_v58   ;;  %v797_v45 = vld [vmem:[#allocation2 + $0x18] sm:$0xff]  ;;  %v571_v8 = vld [vmem:[%s2384_s15 + $0x28] sm:$0xff]  ;;  %v556_v12 = vld [vmem:[%s2379_s12 + $0x30] sm:$0xff] }
 0x194   : > { %2016 = vmatprep.subr.bf16.mxu1 %v921_v3  ;;  %v557_v11 = vld [vmem:[%s2379_s12 + $0x38] sm:$0xff]  ;;  %v572_v16 = vld [vmem:[%s2384_s15 + $0x30] sm:$0xff]  ;;  %v559_v17 = vld [vmem:[%s2379_s12 + $0x48] sm:$0xff] }
 0x195   : > { %1993 = vmatpush3.bf16.msra.mxu0 %v795_v1  ;;  %v573_v15 = vld [vmem:[%s2384_s15 + $0x38] sm:$0xff]  ;;  %v558_v53 = vld [vmem:[%s2379_s12 + $0x40] sm:$0xff]  ;;  %v575_v18 = vld [vmem:[%s2384_s15 + $0x48] sm:$0xff] }
 0x196   : > { %1994 = vmatprep.subr.bf16.mxu0 %v796_v4  ;;  %2017 = vmatpush3.bf16.msra.mxu1 %v921_v3  ;;  %v574_v20 = vld [vmem:[%s2384_s15 + $0x40] sm:$0xff]  ;;  %v561_v13 = vld [vmem:[%s2379_s12 + $0x58] sm:$0xff]  ;;  %v560_v22 = vld [vmem:[%s2379_s12 + $0x50] sm:$0xff] }
 0x197   : > { %604 = vperm.xlu1 %2155, %v553_v59   ;;  %601 = vperm.xlu0 %2154, %v552_v44   ;;  %v577_v23 = vld [vmem:[%s2384_s15 + $0x58] sm:$0xff]  ;;  %v576_v62 = vld [vmem:[%s2384_s15 + $0x50] sm:$0xff]  ;;  %v563_v24 = vld [vmem:[%s2379_s12 + $0x68] sm:$0xff] }
 0x198   : > { %2018 = vmatprep.subr.bf16.mxu1 %v922_v7  ;;  %v562_v25 = vld [vmem:[%s2379_s12 + $0x60] sm:$0xff]  ;;  %v579_v26 = vld [vmem:[%s2384_s15 + $0x68] sm:$0xff]  ;;  %v565_v28 = vld [vmem:[%s2379_s12 + $0x78] sm:$0xff] }
 0x199   : > { %1995 = vmatpush3.bf16.msra.mxu0 %v796_v4  ;;  %v578_v27 = vld [vmem:[%s2384_s15 + $0x60] sm:$0xff]  ;;  %v564_v29 = vld [vmem:[%s2379_s12 + $0x70] sm:$0xff]  ;;  %v581_v30 = vld [vmem:[%s2384_s15 + $0x78] sm:$0xff]  ;;  %s2308_s12 = smov 64  }
 0x19a   : > { %1996 = vmatprep.subr.bf16.mxu0 %v797_v45  ;;  %2019 = vmatpush3.bf16.msra.mxu1 %v922_v7  ;;  %v580_v63 = vld [vmem:[%s2384_s15 + $0x70] sm:$0xff]  ;;  %v1110_v31 = vld [vmem:[%s2389_s18] sm:$0xff]  ;;  %v1111_v32 = vld [vmem:[%s2389_s18 + $0x8] sm:$0xff]  ;;  %s2309_s15 = smov 32  }
 0x19b   : > { %692 = vperm.xlu1 %2155, %v569_v60   ;;  %689 = vperm.xlu0 %2154, %v568_v0   ;;  %v1112_v19 = vld [vmem:[%s2389_s18 + $0x10] sm:$0xff]  ;;  %v1113_v33 = vld [vmem:[%s2389_s18 + $0x18] sm:$0xff]  ;;  %v1114_v34 = vld [vmem:[%s2389_s18 + $0x20] sm:$0xff] }
 0x19c   : > { %2020 = vmatprep.subr.bf16.mxu1 %v923_v10  ;;  %v1115_v35 = vld [vmem:[%s2389_s18 + $0x28] sm:$0xff]  ;;  %v1116_v36 = vld [vmem:[%s2389_s18 + $0x30] sm:$0xff]  ;;  %v1117_v37 = vld [vmem:[%s2389_s18 + $0x38] sm:$0xff] }
 0x19d   : > { %1997 = vmatpush3.bf16.msra.mxu0 %v797_v45  ;;  %v1118_v39 = vld [vmem:[%s2389_s18 + $0x40] sm:$0xff]  ;;  %v1119_v40 = vld [vmem:[%s2389_s18 + $0x48] sm:$0xff]  ;;  %v1120_v41 = vld [vmem:[%s2389_s18 + $0x50] sm:$0xff] }
 0x19e   : > { %2021 = vmatpush3.bf16.msra.mxu1 %v923_v10  ;;  %v1122_v42 = vld [vmem:[%s2389_s18 + $0x60] sm:$0xff]  ;;  %v1121_v43 = vld [vmem:[%s2389_s18 + $0x58] sm:$0xff]  ;;  %v1123_v46 = vld [vmem:[%s2389_s18 + $0x68] sm:$0xff] }
 0x19f   : > { %610 = vperm.xlu1 %2155, %v555_v52   ;;  %607 = vperm.xlu0 %2154, %v554_v5  }
 0x1a3   : > { %698 = vperm.xlu1 %2155, %v571_v8   ;;  %695 = vperm.xlu0 %2154, %v570_v9  }
 0x1a7   : > { %616 = vperm.xlu1 %2155, %v557_v11   ;;  %613 = vperm.xlu0 %2154, %v556_v12  }
 0x1ab   : > { %704 = vperm.xlu1 %2155, %v573_v15   ;;  %701 = vperm.xlu0 %2154, %v572_v16  }
 0x1af   : > { %622 = vperm.xlu1 %2155, %v559_v17   ;;  %619 = vperm.xlu0 %2154, %v558_v53  }
 0x1b3   : > { %710 = vperm.xlu1 %2155, %v575_v18   ;;  %707 = vperm.xlu0 %2154, %v574_v20  }
 0x1b7   : > { %628 = vperm.xlu1 %2155, %v561_v13   ;;  %625 = vperm.xlu0 %2154, %v560_v22  }
 0x1bb   : > { %716 = vperm.xlu1 %2155, %v577_v23   ;;  %713 = vperm.xlu0 %2154, %v576_v62  }
 0x1bf   : > { %634 = vperm.xlu1 %2155, %v563_v24   ;;  %631 = vperm.xlu0 %2154, %v562_v25  }
 0x1c3   : > { %722 = vperm.xlu1 %2155, %v579_v26   ;;  %719 = vperm.xlu0 %2154, %v578_v27  }
 0x1c7   : > { %640 = vperm.xlu1 %2155, %v565_v28   ;;  %637 = vperm.xlu0 %2154, %v564_v29  }
 0x1cb   : > { %728 = vperm.xlu1 %2155, %v581_v30   ;;  %725 = vperm.xlu0 %2154, %v580_v63  }
 0x1cf   : > { %1142 = vrot.lane.b32.xlu1 %v1110_v31, %s2305_s19  ;;  %1144 = vrot.lane.b32.xlu0 %v1111_v32, %s2305_s19 }
 0x1d3   : > { %1146 = vrot.lane.b32.xlu1 %v1112_v19, %s2305_s19  ;;  %1148 = vrot.lane.b32.xlu0 %v1113_v33, %s2305_s19 }
 0x1d7   : > { %1150 = vrot.lane.b32.xlu1 %v1114_v34, %s2305_s19  ;;  %1152 = vrot.lane.b32.xlu0 %v1115_v35, %s2305_s19 }
 0x1db   : > { %1154 = vrot.lane.b32.xlu1 %v1116_v36, %s2305_s19  ;;  %1156 = vrot.lane.b32.xlu0 %v1117_v37, %s2305_s19 }
 0x1df   : > { %1158 = vrot.lane.b32.xlu1 %v1118_v39, %s2305_s19  ;;  %1160 = vrot.lane.b32.xlu0 %v1119_v40, %s2305_s19 }
 0x1e3   : > { %1162 = vrot.lane.b32.xlu1 %v1120_v41, %s2305_s19  ;;  %1166 = vrot.lane.b32.xlu0 %v1122_v42, %s2305_s19 }
 0x1e7   : > { %1164 = vrot.lane.b32.xlu1 %v1121_v43, %s2305_s19 }
 0x1eb   : > { %1168 = vrot.lane.b32.xlu1 %v1123_v46, %s2305_s19 }
 0x20e   : > { %v684_v48 = vpop.permute.xlu1 %683  ;;  %v596_v49 = vpop.permute.xlu0 %595 }
 0x20f   : > { %vm730_vm3 = vcmp.eq.s32.totalorder %v684_v48, %v2658_v38  ;;  %vm642_vm4 = vcmp.eq.s32.totalorder %v596_v49, %v2658_v38 }
 0x210   : > { %v658_v6 = vsel %vm642_vm4, 1.0, %v2306_v54  ;;  %v746_v14 = vsel %vm730_vm3, 1.0, %v2306_v54 }
 0x212   : > { %v687_v50 = vpop.permute.xlu1 %686  ;;  %v599_v51 = vpop.permute.xlu0 %598 }
 0x213   : > { %vm731_vm5 = vcmp.eq.s32.totalorder %v687_v50, %v2658_v38  ;;  %vm643_vm6 = vcmp.eq.s32.totalorder %v599_v51, %v2658_v38 }
 0x214   : > { %v659_v55 = vsel %vm643_vm6, 1.0, %v2306_v54  ;;  %v747_v21 = vsel %vm731_vm5, 1.0, %v2306_v54 }
 0x215   : > { %v674_v57 = vpack.c.bf16 %v659_v55, %v658_v6  ;;  %v762_v58 = vpack.c.bf16 %v747_v21, %v746_v14 }
 0x216   : > { %v605_v59 = vpop.permute.xlu1 %604  ;;  %v602_v44 = vpop.permute.xlu0 %601 }
 0x217   : > { %vm645_vm8 = vcmp.eq.s32.totalorder %v605_v59, %v2658_v38  ;;  %vm644_vm9 = vcmp.eq.s32.totalorder %v602_v44, %v2658_v38  ;;  %1998 = vmatprep.mubr.msk.bf16.mxu0 %vm798_vm7, %v674_v57  ;;  %2022 = vmatprep.mubr.msk.bf16.mxu1 %vm798_vm7, %v762_v58 }
 0x218   : > { %v661_v60 = vsel %vm645_vm8, 1.0, %v2306_v54  ;;  %v660_v61 = vsel %vm644_vm9, 1.0, %v2306_v54 }
 0x219   : > { %v675_v0 = vpack.c.bf16 %v661_v60, %v660_v61 }
 0x21a   : > { %v693_v1 = vpop.permute.xlu1 %692  ;;  %v690_v2 = vpop.permute.xlu0 %689 }
 0x21b   : > { %vm733_vm10 = vcmp.eq.s32.totalorder %v693_v1, %v2658_v38  ;;  %vm732_vm11 = vcmp.eq.s32.totalorder %v690_v2, %v2658_v38  ;;  %1999 = vmatmul.mubr.msk.bf16.vlgmr.msra.gmra.mrb[0].mxu0 %vm798_vm7, %v675_v0 }
 0x21c   : > { %v749_v3 = vsel %vm733_vm10, 1.0, %v2306_v54  ;;  %v748_v4 = vsel %vm732_vm11, 1.0, %v2306_v54 }
 0x21d   : > { %v763_v52 = vpack.c.bf16 %v749_v3, %v748_v4 }
 0x21e   : > { %v611_v5 = vpop.permute.xlu1 %610  ;;  %v608_v7 = vpop.permute.xlu0 %607 }
 0x21f   : > { %vm647_vm12 = vcmp.eq.s32.totalorder %v611_v5, %v2658_v38  ;;  %vm646_vm13 = vcmp.eq.s32.totalorder %v608_v7, %v2658_v38  ;;  %2023 = vmatmul.mubr.msk.bf16.vlgmr.msra.gmra.mrb[0].mxu1 %vm798_vm7, %v763_v52 }
 0x220   : > { %v663_v45 = vsel %vm647_vm12, 1.0, %v2306_v54  ;;  %v662_v8 = vsel %vm646_vm13, 1.0, %v2306_v54 }
 0x221   : > { %v676_v9 = vpack.c.bf16 %v663_v45, %v662_v8 }
 0x222   : > { %v699_v10 = vpop.permute.xlu1 %698  ;;  %v696_v11 = vpop.permute.xlu0 %695 }
 0x223   : > { %vm735_vm14 = vcmp.eq.s32.totalorder %v699_v10, %v2658_v38  ;;  %vm734_vm15 = vcmp.eq.s32.totalorder %v696_v11, %v2658_v38  ;;  %2002 = vmatprep.mubr.msk.bf16.mxu0 %vm798_vm7, %v676_v9 }
 0x224   : > { %v751_v12 = vsel %vm735_vm14, 1.0, %v2306_v54  ;;  %v750_v15 = vsel %vm734_vm15, 1.0, %v2306_v54 }
 0x225   : > { %v764_v16 = vpack.c.bf16 %v751_v12, %v750_v15 }
 0x226   : > { %v617_v17 = vpop.permute.xlu1 %616  ;;  %v614_v53 = vpop.permute.xlu0 %613 }
 0x227   : > { %vm649_vm0 = vcmp.eq.s32.totalorder %v617_v17, %v2658_v38  ;;  %vm648_vm1 = vcmp.eq.s32.totalorder %v614_v53, %v2658_v38  ;;  %2026 = vmatprep.mubr.msk.bf16.mxu1 %vm798_vm7, %v764_v16 }
 0x228   : > { %v665_v18 = vsel %vm649_vm0, 1.0, %v2306_v54  ;;  %v664_v20 = vsel %vm648_vm1, 1.0, %v2306_v54 }
 0x229   : > { %v677_v13 = vpack.c.bf16 %v665_v18, %v664_v20 }
 0x22a   : > { %v705_v22 = vpop.permute.xlu1 %704  ;;  %v702_v23 = vpop.permute.xlu0 %701 }
 0x22b   : > { %vm737_vm2 = vcmp.eq.s32.totalorder %v705_v22, %v2658_v38  ;;  %vm736_vm3 = vcmp.eq.s32.totalorder %v702_v23, %v2658_v38  ;;  %2003 = vmatmul.mubr.msk.bf16.gmra.mrb[4].mxu0 %vm798_vm7, %v677_v13 }
 0x22c   : > { %v753_v62 = vsel %vm737_vm2, 1.0, %v2306_v54  ;;  %v752_v24 = vsel %vm736_vm3, 1.0, %v2306_v54 }
 0x22d   : > { %v765_v25 = vpack.c.bf16 %v753_v62, %v752_v24 }
 0x22e   : > { %v623_v26 = vpop.permute.xlu1 %622  ;;  %v620_v27 = vpop.permute.xlu0 %619 }
 0x22f   : > { %vm651_vm4 = vcmp.eq.s32.totalorder %v623_v26, %v2658_v38  ;;  %vm650_vm5 = vcmp.eq.s32.totalorder %v620_v27, %v2658_v38  ;;  %2027 = vmatmul.mubr.msk.bf16.gmra.mrb[4].mxu1 %vm798_vm7, %v765_v25 }
 0x230   : > { %v667_v28 = vsel %vm651_vm4, 1.0, %v2306_v54  ;;  %v666_v29 = vsel %vm650_vm5, 1.0, %v2306_v54  ;;  %vm1061_vm5 = vcmask 392192  }
 0x231   : > { %v678_v30 = vpack.c.bf16 %v667_v28, %v666_v29 }
 0x232   : > { %v711_v63 = vpop.permute.xlu1 %710  ;;  %v708_v31 = vpop.permute.xlu0 %707 }
 0x233   : > { %vm739_vm6 = vcmp.eq.s32.totalorder %v711_v63, %v2658_v38  ;;  %vm738_vm8 = vcmp.eq.s32.totalorder %v708_v31, %v2658_v38  ;;  %2006 = vmatprep.mubr.msk.bf16.mxu0 %vm798_vm7, %v678_v30 }
 0x234   : > { %v755_v32 = vsel %vm739_vm6, 1.0, %v2306_v54  ;;  %v754_v19 = vsel %vm738_vm8, 1.0, %v2306_v54  ;;  %vm1190_vm6 = vcmask 7168  }
 0x235   : > { %v766_v33 = vpack.c.bf16 %v755_v32, %v754_v19 }
 0x236   : > { %v629_v34 = vpop.permute.xlu1 %628  ;;  %v626_v35 = vpop.permute.xlu0 %625 }
 0x237   : > { %vm653_vm9 = vcmp.eq.s32.totalorder %v629_v34, %v2658_v38  ;;  %vm652_vm10 = vcmp.eq.s32.totalorder %v626_v35, %v2658_v38  ;;  %2030 = vmatprep.mubr.msk.bf16.mxu1 %vm798_vm7, %v766_v33 }
 0x238   : > { %v669_v36 = vsel %vm653_vm9, 1.0, %v2306_v54  ;;  %v668_v37 = vsel %vm652_vm10, 1.0, %v2306_v54 }
 0x239   : > { %v679_v39 = vpack.c.bf16 %v669_v36, %v668_v37 }
 0x23a   : > { %v717_v40 = vpop.permute.xlu1 %716  ;;  %v714_v41 = vpop.permute.xlu0 %713 }
 0x23b   : > { %vm741_vm11 = vcmp.eq.s32.totalorder %v717_v40, %v2658_v38  ;;  %vm740_vm12 = vcmp.eq.s32.totalorder %v714_v41, %v2658_v38  ;;  %2007 = vmatmul.mubr.msk.bf16.gmra.mrb[8].mxu0 %vm798_vm7, %v679_v39 }
 0x23c   : > { %v757_v42 = vsel %vm741_vm11, 1.0, %v2306_v54  ;;  %v756_v43 = vsel %vm740_vm12, 1.0, %v2306_v54 }
 0x23d   : > { %v767_v46 = vpack.c.bf16 %v757_v42, %v756_v43 }
 0x23e   : > { %v635_v48 = vpop.permute.xlu1 %634  ;;  %v632_v49 = vpop.permute.xlu0 %631 }
 0x23f   : > { %vm655_vm13 = vcmp.eq.s32.totalorder %v635_v48, %v2658_v38  ;;  %vm654_vm14 = vcmp.eq.s32.totalorder %v632_v49, %v2658_v38  ;;  %2031 = vmatmul.mubr.msk.bf16.gmra.mrb[8].mxu1 %vm798_vm7, %v767_v46 }
 0x240   : > { %v671_v50 = vsel %vm655_vm13, 1.0, %v2306_v54  ;;  %v670_v51 = vsel %vm654_vm14, 1.0, %v2306_v54 }
 0x241   : > { %v680_v6 = vpack.c.bf16 %v671_v50, %v670_v51  ;;  %v2307_v51 = vmov 1  }
 0x242   : > { %v723_v55 = vpop.permute.xlu1 %722  ;;  %v720_v14 = vpop.permute.xlu0 %719  ;;  %2156 = vset.pattern.permute.xlu0 %v2307_v51  ;;  %2157 = vset.pattern.permute.xlu1 %v2307_v51 }
 0x243   : > { %vm743_vm15 = vcmp.eq.s32.totalorder %v723_v55, %v2658_v38  ;;  %vm742_vm0 = vcmp.eq.s32.totalorder %v720_v14, %v2658_v38  ;;  %2010 = vmatprep.mubr.msk.bf16.mxu0 %vm798_vm7, %v680_v6 }
 0x244   : > { %v759_v21 = vsel %vm743_vm15, 1.0, %v2306_v54  ;;  %v758_v57 = vsel %vm742_vm0, 1.0, %v2306_v54 }
 0x245   : > { %v768_v58 = vpack.c.bf16 %v759_v21, %v758_v57 }
 0x246   : > { %v641_v59 = vpop.permute.xlu1 %640  ;;  %v638_v44 = vpop.permute.xlu0 %637 }
 0x247   : > { %vm657_vm1 = vcmp.eq.s32.totalorder %v641_v59, %v2658_v38  ;;  %vm656_vm2 = vcmp.eq.s32.totalorder %v638_v44, %v2658_v38  ;;  %2034 = vmatprep.mubr.msk.bf16.mxu1 %vm798_vm7, %v768_v58 }
 0x248   : > { %v673_v60 = vsel %vm657_vm1, 1.0, %v2306_v54  ;;  %v672_v61 = vsel %vm656_vm2, 1.0, %v2306_v54 }
 0x249   : > { %v681_v0 = vpack.c.bf16 %v673_v60, %v672_v61 }
 0x24a   : > { %v729_v1 = vpop.permute.xlu1 %728  ;;  %v726_v2 = vpop.permute.xlu0 %725 }
 0x24b   : > { %vm745_vm3 = vcmp.eq.s32.totalorder %v729_v1, %v2658_v38  ;;  %vm744_vm4 = vcmp.eq.s32.totalorder %v726_v2, %v2658_v38  ;;  %2011 = vmatmul.mubr.msk.bf16.gmra.mrb[12].mxu0 %vm798_vm7, %v681_v0 }
 0x24c   : > { %v761_v3 = vsel %vm745_vm3, 1.0, %v2306_v54  ;;  %v760_v4 = vsel %vm744_vm4, 1.0, %v2306_v54  ;;  %vm1543_vm4 = vcmask 261120  }
 0x24d   : > { %v769_v52 = vpack.c.bf16 %v761_v3, %v760_v4 }
 0x24f   : > { %2035 = vmatmul.mubr.msk.bf16.gmra.mrb[12].mxu1 %vm798_vm7, %v769_v52 }
 0x2ee   : > { %v2000_v5 = vpop.f32.mrb[0].mxu0 }
 0x2ef   : > { %v857_v7 = vpop.f32.mrb[1].mxu0 }
 0x2f0   : > { %v2001_v45 = vpop.f32.mrb[2].mxu0 }
 0x2f1   : > { %v860_v8 = vpop.f32.mrb[3].mxu0 }
 0x2f2   : > { %v2740_v9 = vpop.f32.mrb[0].mxu1 }
 0x2f3   : > { %v2742_v10 = vpop.f32.mrb[1].mxu1  ;;  %v1047_v38 = vmul.f32 %v2740_v9, %v2000_v5 }
 0x2f4   : > { %v2745_v11 = vpop.f32.mrb[2].mxu1  ;;  %v1045_v12 = vmul.f32 %v2742_v10, %v857_v7 }
 0x2f5   : > { %v2748_v15 = vpop.f32.mrb[3].mxu1  ;;  %v1068_v54 = vsel %vm1061_vm5, %v1047_v38, 0.0  ;;  %v1048_v16 = vmul.f32 %v2745_v11, %v2001_v45  ;;  %v1124_v38 = vld [vmem:[%s2389_s18 + $0x70] sm:$0xff] }
 0x2f6   : > { %1069 = vadd.xlane.f32.xlu0 %v1068_v54  ;;  %v1046_v17 = vmul.f32 %v2748_v15, %v860_v8  ;;  %v1062_v18 = vsel %vm1061_vm5, %v1045_v12, 0.0  ;;  %v1125_v8 = vld [vmem:[%s2389_s18 + $0x78] sm:$0xff]  ;;  %v1143_v12 = vpop.permute.xlu1 %1142 }
 0x2f7   : > { %v1071_v20 = vsel %vm1061_vm5, %v1048_v16, 0.0  ;;  %v1145_v16 = vpop.permute.xlu0 %1144 }
 0x2f8   : > { %v1065_v53 = vsel %vm1061_vm5, %v1046_v17, 0.0 }
 0x2f9   : > { %1066 = vadd.xlane.f32.xlu1 %v1065_v53 }
 0x2fa   : > { %1063 = vadd.xlane.f32.xlu0 %v1062_v18  ;;  %v1147_v54 = vpop.permute.xlu1 %1146 }
 0x2fb   : > { %v1149_v53 = vpop.permute.xlu0 %1148 }
 0x2fe   : > { %1072 = vadd.xlane.f32.xlu0 %v1071_v20  ;;  %v2004_v13 = vpop.f32.mrb[4].mxu0  ;;  %v1151_v17 = vpop.permute.xlu1 %1150 }
 0x2ff   : > { %v873_v22 = vpop.f32.mrb[5].mxu0  ;;  %v1153_v20 = vpop.permute.xlu0 %1152 }
 0x300   : > { %v2005_v23 = vpop.f32.mrb[6].mxu0 }
 0x301   : > { %v876_v62 = vpop.f32.mrb[7].mxu0 }
 0x302   : > { %v2756_v24 = vpop.f32.mrb[4].mxu1  ;;  %v1155_v18 = vpop.permute.xlu1 %1154 }
 0x303   : > { %v2758_v25 = vpop.f32.mrb[5].mxu1  ;;  %v1051_v26 = vmul.f32 %v2756_v24, %v2004_v13 }
 0x304   : > { %v2761_v27 = vpop.f32.mrb[6].mxu1  ;;  %v1049_v28 = vmul.f32 %v2758_v25, %v873_v22  ;;  %v1157_v22 = vpop.permute.xlu0 %1156 }
 0x305   : > { %v2764_v29 = vpop.f32.mrb[7].mxu1  ;;  %v1080_v30 = vsel %vm1061_vm5, %v1051_v26, 0.0  ;;  %v1052_v63 = vmul.f32 %v2761_v27, %v2005_v23 }
 0x306   : > { %1081 = vadd.xlane.f32.xlu1 %v1080_v30  ;;  %v1050_v31 = vmul.f32 %v2764_v29, %v876_v62  ;;  %v1074_v19 = vsel %vm1061_vm5, %v1049_v28, 0.0  ;;  %v2810_v13 = vpop.permute.xlu1 %1158 }
 0x307   : > { %v1083_v32 = vsel %vm1061_vm5, %v1052_v63, 0.0 }
 0x308   : > { %1084 = vadd.xlane.f32.xlu0 %v1083_v32  ;;  %v1077_v33 = vsel %vm1061_vm5, %v1050_v31, 0.0  ;;  %v2812_v62 = vpop.permute.xlu0 %1160 }
 0x30a   : > { %1075 = vadd.xlane.f32.xlu1 %v1074_v19  ;;  %v1163_v23 = vpop.permute.xlu1 %1162 }
 0x30c   : > { %1078 = vadd.xlane.f32.xlu0 %v1077_v33  ;;  %v2814_v28 = vpop.permute.xlu0 %1166 }
 0x30e   : > { %v2008_v34 = vpop.f32.mrb[8].mxu0  ;;  %v1165_v26 = vpop.permute.xlu1 %1164 }
 0x30f   : > { %v889_v35 = vpop.f32.mrb[9].mxu0 }
 0x310   : > { %v2009_v36 = vpop.f32.mrb[10].mxu0 }
 0x311   : > { %v892_v37 = vpop.f32.mrb[11].mxu0 }
 0x312   : > { %v2772_v39 = vpop.f32.mrb[8].mxu1  ;;  %v2816_v30 = vpop.permute.xlu1 %1168 }
 0x313   : > { %v2774_v40 = vpop.f32.mrb[9].mxu1  ;;  %v1055_v41 = vmul.f32 %v2772_v39, %v2008_v34 }
 0x314   : > { %v2777_v42 = vpop.f32.mrb[10].mxu1  ;;  %v1053_v43 = vmul.f32 %v2774_v40, %v889_v35 }
 0x315   : > { %v2780_v46 = vpop.f32.mrb[11].mxu1  ;;  %v1092_v48 = vsel %vm1061_vm5, %v1055_v41, 0.0  ;;  %v1056_v49 = vmul.f32 %v2777_v42, %v2009_v36 }
 0x316   : > { %1093 = vadd.xlane.f32.xlu1 %v1092_v48  ;;  %v1054_v50 = vmul.f32 %v2780_v46, %v892_v37  ;;  %v1086_v55 = vsel %vm1061_vm5, %v1053_v43, 0.0 }
 0x317   : > { %v1095_v6 = vsel %vm1061_vm5, %v1056_v49, 0.0 }
 0x318   : > { %1096 = vadd.xlane.f32.xlu0 %v1095_v6  ;;  %v1089_v14 = vsel %vm1061_vm5, %v1054_v50, 0.0 }
 0x31a   : > { %1087 = vadd.xlane.f32.xlu1 %v1086_v55 }
 0x31c   : > { %1090 = vadd.xlane.f32.xlu0 %v1089_v14 }
 0x31e   : > { %v2012_v21 = vpop.f32.mrb[12].mxu0 }
 0x31f   : > { %v905_v57 = vpop.f32.mrb[13].mxu0 }
 0x320   : > { %v2013_v58 = vpop.f32.mrb[14].mxu0 }
 0x321   : > { %v908_v59 = vpop.f32.mrb[15].mxu0 }
 0x322   : > { %v2790_v44 = vpop.f32.mrb[12].mxu1 }
 0x323   : > { %v2792_v60 = vpop.f32.mrb[13].mxu1  ;;  %v1059_v61 = vmul.f32 %v2790_v44, %v2012_v21 }
 0x324   : > { %v2795_v0 = vpop.f32.mrb[14].mxu1  ;;  %v1057_v1 = vmul.f32 %v2792_v60, %v905_v57 }
 0x325   : > { %v2798_v2 = vpop.f32.mrb[15].mxu1  ;;  %v1104_v3 = vsel %vm1061_vm5, %v1059_v61, 0.0  ;;  %v1060_v4 = vmul.f32 %v2795_v0, %v2013_v58 }
 0x326   : > { %1105 = vadd.xlane.f32.xlu1 %v1104_v3  ;;  %v1058_v52 = vmul.f32 %v2798_v2, %v908_v59  ;;  %v1098_v7 = vsel %vm1061_vm5, %v1057_v1, 0.0 }
 0x327   : > { %v1107_v5 = vsel %vm1061_vm5, %v1060_v4, 0.0 }
 0x328   : > { %1108 = vadd.xlane.f32.xlu0 %v1107_v5  ;;  %v1101_v45 = vsel %vm1061_vm5, %v1058_v52, 0.0 }
 0x32a   : > { %1099 = vadd.xlane.f32.xlu1 %v1098_v7 }
 0x32c   : > { %1102 = vadd.xlane.f32.xlu0 %v1101_v45 }
 0x33b   : > { %1172 = vrot.lane.b32.xlu1 %v1125_v8, %s2305_s19 }
 0x342   : > { %1170 = vrot.lane.b32.xlu0 %v1124_v38, %s2305_s19 }
 0x383   : > { %v1070_v63 = vpop.xlane.xlu0 %1069 }
 0x384   : > { %v1193_v31 = vsel %vm1190_vm6, %v1070_v63, %v1147_v54 }
 0x385   : > { %v1211_v34 = vmul.f32 1.442695, %v1193_v31 }
 0x386   : > { %v1067_v32 = vpop.xlane.xlu1 %1066 }
 0x387   : > { %v1192_v19 = vsel %vm1190_vm6, %v1067_v32, %v1145_v16  ;;  %v1064_v33 = vpop.xlane.xlu0 %1063 }
 0x388   : > { %v1209_v35 = vmul.f32 1.442695, %v1192_v19  ;;  %v1191_v36 = vsel %vm1190_vm6, %v1064_v33, %v1143_v12 }
 0x389   : > { %v1207_v37 = vmul.f32 1.442695, %v1191_v36 }
 0x38a   : > { %2241 = vpow2.f32 %v1209_v35 }
 0x38b   : > { %2243 = vpow2.f32 %v1207_v37  ;;  %v1073_v41 = vpop.xlane.xlu0 %1072 }
 0x38c   : > { %2245 = vpow2.f32 %v1211_v34  ;;  %v1194_v43 = vsel %vm1190_vm6, %v1073_v41, %v1149_v53 }
 0x38d   : > { %v1213_v48 = vmul.f32 1.442695, %v1194_v43 }
 0x38f   : > { %2247 = vpow2.f32 %v1213_v48 }
 0x393   : > { %v1082_v49 = vpop.xlane.xlu1 %1081 }
 0x394   : > { %v2242_v50 = vpop.eup %2241  ;;  %v1197_v55 = vsel %vm1190_vm6, %v1082_v49, %v1155_v18 }
 0x395   : > { %v2244_v6 = vpop.eup %2243  ;;  %v1085_v14 = vpop.xlane.xlu0 %1084  ;;  %v2823_v21 = vmin.f32 %v2242_v50, 5.0  ;;  %v1219_v61 = vmul.f32 1.442695, %v1197_v55 }
 0x396   : > { %v2246_v57 = vpop.eup %2245  ;;  %v2825_v58 = vmin.f32 %v2244_v6, 5.0  ;;  %v1198_v1 = vsel %vm1190_vm6, %v1085_v14, %v1157_v22 }
 0x397   : > { %v1076_v59 = vpop.xlane.xlu1 %1075  ;;  %1356 = vperm.xlu1 %2157, %v2823_v21   ;;  %v2833_v45 = vmin.f32 %v2246_v57, 5.0  ;;  %v1221_v12 = vmul.f32 1.442695, %v1198_v1 }
 0x398   : > { %v1195_v3 = vsel %vm1190_vm6, %v1076_v59, %v1151_v17  ;;  %1352 = vperm.xlu0 %2156, %v2825_v58   ;;  %v2160_v4 = vpack.i.bf16 %v2823_v21, %v2825_v58 }
 0x399   : > { %v2248_v52 = vpop.eup %2247  ;;  %v1215_v5 = vmul.f32 1.442695, %v1195_v3  ;;  %v1079_v7 = vpop.xlane.xlu0 %1078 }
 0x39a   : > { %v1196_v8 = vsel %vm1190_vm6, %v1079_v7, %v1153_v20  ;;  %v2836_v38 = vmin.f32 %v2248_v52, 5.0 }
 0x39b   : > { %2249 = vpow2.f32 %v1215_v5  ;;  %v1217_v54 = vmul.f32 1.442695, %v1196_v8  ;;  %1360 = vperm.xlu1 %2157, %v2833_v45  }
 0x39c   : > { %2251 = vpow2.f32 %v1219_v61  ;;  %1364 = vperm.xlu0 %2156, %v2836_v38   ;;  %v2165_v16 = vpack.i.bf16 %v2836_v38, %v2833_v45 }
 0x39d   : > { %2253 = vpow2.f32 %v1217_v54 }
 0x39e   : > { %2255 = vpow2.f32 %v1221_v12 }
 0x3a3   : > { %v1094_v17 = vpop.xlane.xlu1 %1093 }
 0x3a4   : > { %v1201_v18 = vsel %vm1190_vm6, %v1094_v17, %v1163_v23 }
 0x3a5   : > { %v2250_v53 = vpop.eup %2249  ;;  %v1097_v20 = vpop.xlane.xlu0 %1096  ;;  %v1227_v19 = vmul.f32 1.442695, %v1201_v18 }
 0x3a6   : > { %v2252_v22 = vpop.eup %2251  ;;  %v2843_v63 = vmin.f32 %v2250_v53, 5.0  ;;  %v1202_v33 = vsel %vm1190_vm6, %v1097_v20, %v1165_v26 }
 0x3a7   : > { %v2254_v31 = vpop.eup %2253  ;;  %v1088_v32 = vpop.xlane.xlu1 %1087  ;;  %v2854_v43 = vmin.f32 %v2252_v22, 5.0  ;;  %v1229_v48 = vmul.f32 1.442695, %v1202_v33 }
 0x3a8   : > { %v1199_v34 = vsel %vm1190_vm6, %v1088_v32, %v2810_v13  ;;  %1368 = vperm.xlu1 %2157, %v2843_v63   ;;  %v2849_v35 = vmin.f32 %v2254_v31, 5.0  ;;  %v2256_v36 = vpop.eup %2255 }
 0x3a9   : > { %v1223_v37 = vmul.f32 1.442695, %v1199_v34  ;;  %v1091_v41 = vpop.xlane.xlu0 %1090  ;;  %v2859_v49 = vmin.f32 %v2256_v36, 5.0 }
 0x3aa   : > { %v1200_v23 = vsel %vm1190_vm6, %v1091_v41, %v2812_v62  ;;  %1372 = vperm.xlu0 %2156, %v2849_v35   ;;  %v2170_v26 = vpack.i.bf16 %v2849_v35, %v2843_v63 }
 0x3ab   : > { %2257 = vpow2.f32 %v1223_v37  ;;  %v1225_v13 = vmul.f32 1.442695, %v1200_v23 }
 0x3ac   : > { %2259 = vpow2.f32 %v1227_v19  ;;  %1376 = vperm.xlu1 %2157, %v2854_v43  }
 0x3ad   : > { %2261 = vpow2.f32 %v1225_v13 }
 0x3ae   : > { %1380 = vperm.xlu0 %2156, %v2859_v49   ;;  %2263 = vpow2.f32 %v1229_v48 }
 0x3b3   : > { %v1106_v62 = vpop.xlane.xlu1 %1105 }
 0x3b5   : > { %v2258_v50 = vpop.eup %2257  ;;  %v1109_v6 = vpop.xlane.xlu0 %1108 }
 0x3b6   : > { %v2260_v55 = vpop.eup %2259  ;;  %v1247_v14 = vmin.f32 %v2258_v50, 5.0 }
 0x3b7   : > { %v2262_v57 = vpop.eup %2261  ;;  %v1100_v59 = vpop.xlane.xlu1 %1099  ;;  %v1249_v8 = vmin.f32 %v2260_v55, 5.0 }
 0x3b8   : > { %v1203_v61 = vsel %vm1190_vm6, %v1100_v59, %v2814_v28  ;;  %1384 = vperm.xlu1 %2157, %v1247_v14   ;;  %v1248_v1 = vmin.f32 %v2262_v57, 5.0  ;;  %v2264_v3 = vpop.eup %2263 }
 0x3b9   : > { %v1231_v52 = vmul.f32 1.442695, %v1203_v61  ;;  %v1103_v5 = vpop.xlane.xlu0 %1102  ;;  %v1250_v18 = vmin.f32 %v2264_v3, 5.0 }
 0x3ba   : > { %v1204_v7 = vsel %vm1190_vm6, %v1103_v5, %v2816_v30  ;;  %1388 = vperm.xlu0 %2156, %v1248_v1   ;;  %v2180_v12 = vpack.i.bf16 %v1248_v1, %v1247_v14 }
 0x3bb   : > { %2265 = vpow2.f32 %v1231_v52  ;;  %v1233_v54 = vmul.f32 1.442695, %v1204_v7  ;;  %v1173_v17 = vpop.permute.xlu1 %1172 }
 0x3bc   : > { %v1206_v53 = vsel %vm1190_vm6, %v1109_v6, %v1173_v17  ;;  %1392 = vperm.xlu1 %2157, %v1249_v8  }
 0x3bd   : > { %2267 = vpow2.f32 %v1233_v54  ;;  %v1237_v28 = vmul.f32 1.442695, %v1206_v53  ;;  %v1171_v20 = vpop.permute.xlu0 %1170 }
 0x3be   : > { %v1205_v22 = vsel %vm1190_vm6, %v1106_v62, %v1171_v20  ;;  %1396 = vperm.xlu0 %2156, %v1250_v18  }
 0x3bf   : > { %2269 = vpow2.f32 %v1237_v28  ;;  %v1235_v31 = vmul.f32 1.442695, %v1205_v22 }
 0x3c1   : > { %2271 = vpow2.f32 %v1235_v31 }
 0x3c5   : > { %v2266_v30 = vpop.eup %2265 }
 0x3c6   : > { %v1251_v32 = vmin.f32 %v2266_v30, 5.0 }
 0x3c7   : > { %v2268_v19 = vpop.eup %2267 }
 0x3c8   : > { %1400 = vperm.xlu1 %2157, %v1251_v32   ;;  %v1252_v33 = vmin.f32 %v2268_v19, 5.0 }
 0x3c9   : > { %v2270_v34 = vpop.eup %2269 }
 0x3ca   : > { %1404 = vperm.xlu0 %2156, %v1252_v33   ;;  %v2220_v36 = vpack.i.bf16 %v1252_v33, %v1251_v32  ;;  %v1254_v41 = vmin.f32 %v2270_v34, 5.0 }
 0x3cb   : > { %v2272_v37 = vpop.eup %2271 }
 0x3cc   : > { %v1253_v23 = vmin.f32 %v2272_v37, 5.0 }
 0x3ce   : > { %1412 = vperm.xlu0 %2156, %v1254_v41   ;;  %1408 = vperm.xlu1 %2157, %v1253_v23  }
 0x3d2   : > { %2159 = vset.pattern.permute.xlu0 %v2304_v56  ;;  %2158 = vset.pattern.permute.xlu1 %v2304_v56  ;;  %v2175_v56 = vpack.i.bf16 %v2859_v49, %v2854_v43 }
 0x3d3   : > { %1262 = vperm.xlu0 %2159, %v2823_v21   ;;  %1257 = vperm.xlu1 %2158, %v2825_v58   ;;  %v2215_v21 = vpack.i.bf16 %v1250_v18, %v1249_v8  ;;  %v2235_v58 = vpack.i.bf16 %v1254_v41, %v1253_v23 }
 0x3d7   : > { %1277 = vperm.xlu0 %2159, %v2843_v63   ;;  %1267 = vperm.xlu1 %2158, %v2833_v45  }
 0x3db   : > { %1287 = vperm.xlu0 %2159, %v2854_v43   ;;  %1272 = vperm.xlu1 %2158, %v2836_v38  }
 0x3df   : > { %1297 = vperm.xlu0 %2159, %v1247_v14   ;;  %1282 = vperm.xlu1 %2158, %v2849_v35  }
 0x3e3   : > { %1307 = vperm.xlu0 %2159, %v1249_v8   ;;  %2161 = vrot.lane.b32.xlu1 %v2160_v4, %s2308_s12 }
 0x3e7   : > { %1317 = vperm.xlu0 %2159, %v1251_v32   ;;  %1292 = vperm.xlu1 %2158, %v2859_v49  }
 0x3eb   : > { %2166 = vrot.lane.b32.xlu1 %v2165_v16, %s2308_s12 }
 0x3ef   : > { %1302 = vperm.xlu1 %2158, %v1248_v1  }
 0x3f3   : > { %2171 = vrot.lane.b32.xlu1 %v2170_v26, %s2308_s12 }
 0x3f7   : > { %1312 = vperm.xlu1 %2158, %v1250_v18  }
 0x3fb   : > { %2176 = vrot.lane.b32.xlu1 %v2175_v56, %s2308_s12  ;;  %v1926_v56 = vld [vmem:[%s286_s8] ss:$0 sm:$0xff] }
 0x3ff   : > { %2181 = vrot.lane.b32.xlu1 %v2180_v12, %s2308_s12 }
 0x403   : > { %1322 = vperm.xlu1 %2158, %v1252_v33   ;;  %v586_v33 = vshrl.u32 %v583_v47, 7 }
 0x405   : > { %v590_v37 = vadd.s32 32, %v586_v33  ;;  %vm774_vm8 = vcmp.eq.s32.totalorder %v1926_v56, %v586_v33  ;;  %v593_v47 = vadd.s32 56, %v586_v33 }
 0x407   : > { %1332 = vperm.xlu1 %2158, %v1254_v41   ;;  %v591_v41 = vadd.s32 40, %v586_v33  ;;  %vm778_vm10 = vcmp.eq.s32.totalorder %v1926_v56, %v590_v37  ;;  %vm781_vm2 = vcmp.eq.s32.totalorder %v1926_v56, %v593_v47 }
 0x409   : > { %vm779_vm12 = vcmp.eq.s32.totalorder %v1926_v56, %v591_v41 }
 0x40a   : > { %vm1947_vm15 = vmpackc.low %vm779_vm12, %vm778_vm10 }
 0x40b   : > { %2216 = vrot.lane.b32.xlu1 %v2215_v21, %s2308_s12  ;;  %v588_v21 = vadd.s32 16, %v586_v33 }
 0x40d   : > { %vm776_vm13 = vcmp.eq.s32.totalorder %v1926_v56, %v588_v21 }
 0x40f   : > { %2221 = vrot.lane.b32.xlu1 %v2220_v36, %s2308_s12 }
 0x413   : > { %2236 = vrot.lane.b32.xlu1 %v2235_v58, %s2308_s12  ;;  %v589_v58 = vadd.s32 24, %v586_v33 }
 0x415   : > { %vm777_vm14 = vcmp.eq.s32.totalorder %v1926_v56, %v589_v58 }
 0x416   : > { %v1357_v4 = vpop.permute.xlu1 %1356  ;;  %vm2922_vm1 = vmpackc.low %vm777_vm14, %vm776_vm13 }
 0x417   : > { %v1416_v45 = vmul.f32 %v1357_v4, %v2748_v15  ;;  %v1353_v38 = vpop.permute.xlu0 %1352  ;;  %v592_v4 = vadd.s32 48, %v586_v33 }
 0x418   : > { %v1415_v16 = vmul.f32 %v1353_v38, %v2742_v10  ;;  %v1581_v38 = vld [vmem:[#allocation4 + $0x28] sm:$0xff] }
 0x419   : > { %vm780_vm0 = vcmp.eq.s32.totalorder %v1926_v56, %v592_v4 }
 0x41a   : > { %v2190_v63 = vpack.i.bf16 %v1416_v45, %v1415_v16  ;;  %v1361_v35 = vpop.permute.xlu1 %1360  ;;  %v2310_v45 = vmov 1.0|1.0   ;;  %vm2926_vm3 = vmpackc.low %vm781_vm2, %vm780_vm0 }
 0x41b   : > { %v1417_v26 = vmul.f32 %v2740_v9, %v1361_v35  ;;  %v1365_v43 = vpop.permute.xlu0 %1364  ;;  %2058 = vmatprep.mubr.msk.bf16.mxu1 %vm1947_vm15, %v2310_v45 }
 0x41c   : > { %v1418_v48 = vmul.f32 %v2745_v11, %v1365_v43 }
 0x41e   : > { %v2185_v13 = vpack.i.bf16 %v1418_v48, %v1417_v26 }
 0x420   : > { %2186 = vrot.lane.b32.xlu0 %v2185_v13, %s2309_s15 }
 0x424   : > { %2191 = vrot.lane.b32.xlu0 %v2190_v63, %s2309_s15 }
 0x427   : > { %v1369_v49 = vpop.permute.xlu1 %1368 }
 0x428   : > { %v1419_v50 = vmul.f32 %v1369_v49, %v2758_v25 }
 0x429   : > { %v1373_v62 = vpop.permute.xlu0 %1372 }
 0x42a   : > { %v1420_v6 = vmul.f32 %v1373_v62, %v2764_v29 }
 0x42b   : > { %v1377_v55 = vpop.permute.xlu1 %1376 }
 0x42c   : > { %v2200_v14 = vpack.i.bf16 %v1420_v6, %v1419_v50  ;;  %v1421_v59 = vmul.f32 %v2756_v24, %v1377_v55 }
 0x42d   : > { %v1381_v57 = vpop.permute.xlu0 %1380 }
 0x42e   : > { %v1422_v61 = vmul.f32 %v2761_v27, %v1381_v57 }
 0x430   : > { %v2195_v1 = vpack.i.bf16 %v1422_v61, %v1421_v59 }
 0x432   : > { %2196 = vrot.lane.b32.xlu0 %v2195_v1, %s2309_s15 }
 0x436   : > { %2201 = vrot.lane.b32.xlu0 %v2200_v14, %s2309_s15 }
 0x437   : > { %v1385_v3 = vpop.permute.xlu1 %1384 }
 0x438   : > { %v1423_v5 = vmul.f32 %v1385_v3, %v2774_v40 }
 0x439   : > { %v1389_v52 = vpop.permute.xlu0 %1388 }
 0x43a   : > { %v1424_v7 = vmul.f32 %v1389_v52, %v2780_v46  ;;  %1327 = vperm.xlu0 %2159, %v1253_v23  }
 0x43b   : > { %v1393_v8 = vpop.permute.xlu1 %1392 }
 0x43c   : > { %v2205_v12 = vpack.i.bf16 %v1424_v7, %v1423_v5  ;;  %v1425_v17 = vmul.f32 %v2772_v39, %v1393_v8 }
 0x43d   : > { %v1397_v54 = vpop.permute.xlu0 %1396 }
 0x43e   : > { %v1426_v53 = vmul.f32 %v2777_v42, %v1397_v54  ;;  %2206 = vrot.lane.b32.xlu0 %v2205_v12, %s2309_s15 }
 0x43f   : > { %2240 = vset.pattern.permute.xlu0 %v2307_v51  ;;  %v587_v51 = vadd.s32 8, %v586_v33 }
 0x440   : > { %v2210_v18 = vpack.i.bf16 %v1426_v53, %v1425_v17 }
 0x441   : > { %vm775_vm9 = vcmp.eq.s32.totalorder %v1926_v56, %v587_v51 }
 0x442   : > { %2211 = vrot.lane.b32.xlu0 %v2210_v18, %s2309_s15  ;;  %vm1943_vm11 = vmpackc.low %vm775_vm9, %vm774_vm8 }
 0x443   : > { %2054 = vmatprep.mubr.msk.bf16.mxu0 %vm1943_vm11, %v2310_v45 }
 0x447   : > { %v1401_v28 = vpop.permute.xlu1 %1400 }
 0x448   : > { %v1427_v22 = vmul.f32 %v1401_v28, %v2792_v60 }
 0x449   : > { %v1405_v20 = vpop.permute.xlu0 %1404 }
 0x44a   : > { %v1428_v31 = vmul.f32 %v1405_v20, %v2798_v2 }
 0x44c   : > { %v2225_v30 = vpack.i.bf16 %v1428_v31, %v1427_v22 }
 0x44d   : > { %v1409_v32 = vpop.permute.xlu1 %1408  ;;  %v1413_v19 = vpop.permute.xlu0 %1412 }
 0x44e   : > { %v1429_v34 = vmul.f32 %v2790_v44, %v1409_v32  ;;  %v1430_v36 = vmul.f32 %v2795_v0, %v1413_v19  ;;  %2226 = vrot.lane.b32.xlu0 %v2225_v30, %s2309_s15 }
 0x450   : > { %v2230_v23 = vpack.i.bf16 %v1430_v36, %v1429_v34 }
 0x452   : > { %2231 = vrot.lane.b32.xlu0 %v2230_v23, %s2309_s15  ;;  %v1258_v63 = vpop.permute.xlu1 %1257  ;;  %v1263_v26 = vpop.permute.xlu0 %1262 }
 0x453   : > { %v1335_v17 = vmul.f32 %v1258_v63, %v2742_v10  ;;  %v1336_v20 = vmul.f32 %v1263_v26, %v2748_v15 }
 0x456   : > { %v1268_v35 = vpop.permute.xlu1 %1267  ;;  %v1278_v48 = vpop.permute.xlu0 %1277 }
 0x457   : > { %v1337_v1 = vmul.f32 %v2740_v9, %v1268_v35  ;;  %v1339_v35 = vmul.f32 %v1278_v48, %v2758_v25 }
 0x45a   : > { %v1273_v43 = vpop.permute.xlu1 %1272  ;;  %v1288_v49 = vpop.permute.xlu0 %1287 }
 0x45b   : > { %v1338_v3 = vmul.f32 %v2745_v11, %v1273_v43  ;;  %v1341_v41 = vmul.f32 %v2756_v24, %v1288_v49 }
 0x45e   : > { %v1283_v13 = vpop.permute.xlu1 %1282  ;;  %v2930_v50 = vpop.permute.xlu0 %1297 }
 0x462   : > { %v2162_v62 = vpop.permute.xlu1 %2161  ;;  %v2932_v55 = vpop.permute.xlu0 %1307 }
 0x463   : > { %v2164_v30 = vunpack.i.h.bf16 %v2162_v62  ;;  %v2163_v32 = vunpack.i.l.bf16 %v2162_v62 }
 0x466   : > { %v1293_v6 = vpop.permute.xlu1 %1292  ;;  %v2934_v57 = vpop.permute.xlu0 %1317 }
 0x467   : > { %v1342_v23 = vmul.f32 %v2761_v27, %v1293_v6 }
 0x46a   : > { %v2167_v14 = vpop.permute.xlu1 %2166 }
 0x46b   : > { %v2169_v7 = vunpack.i.h.bf16 %v2167_v14  ;;  %v2168_v8 = vunpack.i.l.bf16 %v2167_v14  ;;  %v1340_v14 = vmul.f32 %v1283_v13, %v2764_v29 }
 0x46e   : > { %v2936_v59 = vpop.permute.xlu1 %1302 }
 0x472   : > { %v2172_v9 = vpop.permute.xlu1 %2171 }
 0x473   : > { %v2174_v6 = vunpack.i.h.bf16 %v2172_v9 }
 0x476   : > { %v1313_v51 = vpop.permute.xlu1 %1312 }
 0x47a   : > { %v2177_v15 = vpop.permute.xlu1 %2176 }
 0x47b   : > { %v2179_v58 = vunpack.i.h.bf16 %v2177_v15  ;;  %v2178_v4 = vunpack.i.l.bf16 %v2177_v15 }
 0x492   : > { %v2187_v61 = vpop.permute.xlu0 %2186 }
 0x493   : > { %v2189_v52 = vunpack.i.h.bf16 %v2187_v61  ;;  %v2188_v5 = vunpack.i.l.bf16 %v2187_v61  ;;  %v2173_v61 = vunpack.i.l.bf16 %v2172_v9 }
 0x495   : > { %v1547_v12 = vsel %vm1543_vm4, %v1338_v3, %v2189_v52  ;;  %v1546_v54 = vsel %vm1543_vm4, %v1337_v1, %v2188_v5  ;;  %v2182_v1 = vpop.permute.xlu1 %2181 }
 0x496   : > { %v2192_v53 = vpop.permute.xlu0 %2191  ;;  %v1562_v18 = vsel %vm798_vm7, %v1546_v54, %v2168_v8  ;;  %v1563_v28 = vsel %vm798_vm7, %v1547_v12, %v2169_v7  ;;  %v1343_v54 = vmul.f32 %v2930_v50, %v2774_v40  ;;  %v1346_v40 = vmul.f32 %v2777_v42, %v1313_v51 }
 0x497   : > { %v2194_v22 = vunpack.i.h.bf16 %v2192_v53  ;;  %v2193_v11 = vunpack.i.l.bf16 %v2192_v53  ;;  %v1585_v31 = vpack.c.bf16 %v1563_v28, %v1562_v18  ;;  %v2184_v28 = vunpack.i.h.bf16 %v2182_v1 }
 0x499   : > { %v1545_v19 = vsel %vm1543_vm4, %v1336_v20, %v2194_v22  ;;  %v1544_v33 = vsel %vm1543_vm4, %v1335_v17, %v2193_v11  ;;  %v1323_v7 = vpop.permute.xlu1 %1322  ;;  %v1344_v17 = vmul.f32 %v2936_v59, %v2780_v46  ;;  %v2183_v20 = vunpack.i.l.bf16 %v2182_v1  ;;  %v1582_v1 = vld [vmem:[#allocation4 + $0x30] sm:$0xff] }
 0x49a   : > { %v1560_v34 = vsel %vm798_vm7, %v1544_v33, %v2163_v32  ;;  %v1561_v10 = vsel %vm798_vm7, %v1545_v19, %v2164_v30  ;;  %v1345_v11 = vmul.f32 %v2772_v39, %v2932_v55  ;;  %v1347_v39 = vmul.f32 %v2934_v57, %v2792_v60 }
 0x49b   : > { %v1584_v36 = vpack.c.bf16 %v1561_v10, %v1560_v34  ;;  %v1348_v15 = vmul.f32 %v1323_v7, %v2798_v2  ;;  %v1583_v7 = vld [vmem:[#allocation4 + $0x38] sm:$0xff] }
 0x49d   : > { %2038 = vmatprep.subr.bf16.mxu0 %v1584_v36  ;;  %2062 = vmatprep.subr.bf16.mxu1 %v1584_v36  ;;  %v1333_v29 = vpop.permute.xlu1 %1332 }
 0x49e   : > { %2039 = vmatpush3.bf16.msra.mxu0 %v1584_v36  ;;  %2070 = vmatpush3.bf16.msra.mxu1 %v1584_v36  ;;  %v1350_v60 = vmul.f32 %v2795_v0, %v1333_v29 }
 0x49f   : > { %2040 = vmatprep.subr.bf16.mxu0 %v1585_v31  ;;  %2063 = vmatprep.subr.bf16.mxu1 %v1585_v31 }
 0x4a1   : > { %v2217_v8 = vpop.permute.xlu1 %2216 }
 0x4a2   : > { %2041 = vmatpush3.bf16.msra.mxu0 %v1585_v31  ;;  %2071 = vmatpush3.bf16.msra.mxu1 %v1585_v31  ;;  %v2219_v33 = vunpack.i.h.bf16 %v2217_v8  ;;  %v2218_v34 = vunpack.i.l.bf16 %v2217_v8 }
 0x4a4   : > { %v2197_v37 = vpop.permute.xlu0 %2196 }
 0x4a5   : > { %v2199_v56 = vunpack.i.h.bf16 %v2197_v37  ;;  %v2198_v21 = vunpack.i.l.bf16 %v2197_v37  ;;  %v2222_v50 = vpop.permute.xlu1 %2221 }
 0x4a7   : > { %v1551_v47 = vsel %vm1543_vm4, %v1342_v23, %v2199_v56  ;;  %v1550_v63 = vsel %vm1543_vm4, %v1341_v41, %v2198_v21  ;;  %v2224_v56 = vunpack.i.h.bf16 %v2222_v50  ;;  %v2223_v21 = vunpack.i.l.bf16 %v2222_v50 }
 0x4a8   : > { %v2202_v26 = vpop.permute.xlu0 %2201  ;;  %v1566_v43 = vsel %vm798_vm7, %v1550_v63, %v2178_v4  ;;  %v1567_v62 = vsel %vm798_vm7, %v1551_v47, %v2179_v58 }
 0x4a9   : > { %v2204_v24 = vunpack.i.h.bf16 %v2202_v26  ;;  %v2203_v49 = vunpack.i.l.bf16 %v2202_v26  ;;  %v1587_v27 = vpack.c.bf16 %v1567_v62, %v1566_v43  ;;  %v2237_v58 = vpop.permute.xlu1 %2236 }
 0x4ab   : > { %v1549_v3 = vsel %vm1543_vm4, %v1340_v14, %v2204_v24  ;;  %v1548_v52 = vsel %vm1543_vm4, %v1339_v35, %v2203_v49  ;;  %v2239_v14 = vunpack.i.h.bf16 %v2237_v58  ;;  %v2238_v24 = vunpack.i.l.bf16 %v2237_v58 }
 0x4ac   : > { %v1564_v5 = vsel %vm798_vm7, %v1548_v52, %v2173_v61  ;;  %v1565_v25 = vsel %vm798_vm7, %v1549_v3, %v2174_v6  ;;  %v1576_v3 = vld [vmem:[#allocation4] sm:$0xff] }
 0x4ad   : > { %v1586_v48 = vpack.c.bf16 %v1565_v25, %v1564_v5  ;;  %v1580_v52 = vld [vmem:[#allocation4 + $0x20] sm:$0xff] }
 0x4af   : > { %2042 = vmatprep.subr.bf16.mxu0 %v1586_v48  ;;  %2064 = vmatprep.subr.bf16.mxu1 %v1586_v48 }
 0x4b0   : > { %2043 = vmatpush3.bf16.msra.mxu0 %v1586_v48  ;;  %2072 = vmatpush3.bf16.msra.mxu1 %v1586_v48  ;;  %v1579_v48 = vld [vmem:[#allocation4 + $0x18] sm:$0xff] }
 0x4b1   : > { %2044 = vmatprep.subr.bf16.mxu0 %v1587_v27  ;;  %2065 = vmatprep.subr.bf16.mxu1 %v1587_v27 }
 0x4b4   : > { %2045 = vmatpush3.bf16.msra.mxu0 %v1587_v27  ;;  %2073 = vmatpush3.bf16.msra.mxu1 %v1587_v27 }
 0x4b9   : > { %v1328_v13 = vpop.permute.xlu0 %1327 }
 0x4ba   : > { %v1349_v35 = vmul.f32 %v2790_v44, %v1328_v13  ;;  %v1578_v44 = vld [vmem:[#allocation4 + $0x10] sm:$0xff] }
 0x4bd   : > { %v2207_v12 = vpop.permute.xlu0 %2206 }
 0x4be   : > { %v2209_v53 = vunpack.i.h.bf16 %v2207_v12  ;;  %v2208_v18 = vunpack.i.l.bf16 %v2207_v12 }
 0x4c0   : > { %v1553_v9 = vsel %vm1543_vm4, %v1344_v17, %v2209_v53  ;;  %v1552_v22 = vsel %vm1543_vm4, %v1343_v54, %v2208_v18  ;;  %v1577_v54 = vld [vmem:[#allocation4 + $0x8] sm:$0xff] }
 0x4c1   : > { %v2212_v31 = vpop.permute.xlu0 %2211  ;;  %v1568_v30 = vsel %vm798_vm7, %v1552_v22, %v2183_v20  ;;  %v1569_v32 = vsel %vm798_vm7, %v1553_v9, %v2184_v28 }
 0x4c2   : > { %v2214_v46 = vunpack.i.h.bf16 %v2212_v31  ;;  %v2213_v59 = vunpack.i.l.bf16 %v2212_v31  ;;  %v1588_v19 = vpack.c.bf16 %v1569_v32, %v1568_v30 }
 0x4c4   : > { %v1555_v10 = vsel %vm1543_vm4, %v1346_v40, %v2214_v46  ;;  %v1554_v36 = vsel %vm1543_vm4, %v1345_v11, %v2213_v59  ;;  %2046 = vmatprep.subr.bf16.mxu0 %v1588_v19  ;;  %2066 = vmatprep.subr.bf16.mxu1 %v1588_v19  ;;  %v2311_v40 = vmov (!%p1951_p6), 65  }
 0x4c5   : > { %v2227_v55 = vpop.permute.xlu0 %2226  ;;  %2047 = vmatpush3.bf16.msra.mxu0 %v1588_v19  ;;  %2074 = vmatpush3.bf16.msra.mxu1 %v1588_v19  ;;  %v1570_v42 = vsel %vm798_vm7, %v1554_v36, %v2218_v34  ;;  %v1571_v51 = vsel %vm798_vm7, %v1555_v10, %v2219_v33 }
 0x4c6   : > { %v2229_v37 = vunpack.i.h.bf16 %v2227_v55  ;;  %v2228_v41 = vunpack.i.l.bf16 %v2227_v55  ;;  %v1589_v23 = vpack.c.bf16 %v1571_v51, %v1570_v42  ;;  %2274 = vset.pattern.permute.xlu1 (!%p1951_p6), %v2311_v40  ;;  %2273 = vset.pattern.permute.xlu0 (!%p1951_p6), %v2311_v40 }
 0x4c8   : > { %v1557_v4 = vsel %vm1543_vm4, %v1348_v15, %v2229_v37  ;;  %v1556_v47 = vsel %vm1543_vm4, %v1347_v39, %v2228_v41  ;;  %2048 = vmatprep.subr.bf16.mxu0 %v1589_v23  ;;  %2067 = vmatprep.subr.bf16.mxu1 %v1589_v23 }
 0x4c9   : > { %v2232_v57 = vpop.permute.xlu0 %2231  ;;  %2049 = vmatpush3.bf16.msra.mxu0 %v1589_v23  ;;  %2075 = vmatpush3.bf16.msra.mxu1 %v1589_v23  ;;  %v1572_v63 = vsel %vm798_vm7, %v1556_v47, %v2223_v21  ;;  %v1573_v2 = vsel %vm798_vm7, %v1557_v4, %v2224_v56 }
 0x4ca   : > { %v2234_v26 = vunpack.i.h.bf16 %v2232_v57  ;;  %v2233_v43 = vunpack.i.l.bf16 %v2232_v57  ;;  %v1590_v62 = vpack.c.bf16 %v1573_v2, %v1572_v63 }
 0x4cc   : > { %v1559_v49 = vsel %vm1543_vm4, %v1350_v60, %v2234_v26  ;;  %v1558_v27 = vsel %vm1543_vm4, %v1349_v35, %v2233_v43  ;;  %2050 = vmatprep.subr.bf16.mxu0 %v1590_v62  ;;  %2068 = vmatprep.subr.bf16.mxu1 %v1590_v62  ;;  %v2312_v60 = vmov (!%p1951_p6), 64  }
 0x4cd   : > { %v1575_v0 = vsel %vm798_vm7, %v1559_v49, %v2239_v14  ;;  %v1574_v6 = vsel %vm798_vm7, %v1558_v27, %v2238_v24  ;;  %2051 = vmatpush3.bf16.msra.mxu0 %v1590_v62  ;;  %2076 = vmatpush3.bf16.msra.mxu1 %v1590_v62  ;;  %vm1665_vm7 = vcmask 539648  }
 0x4ce   : > { %v1591_v61 = vpack.c.bf16 %v1575_v0, %v1574_v6 }
 0x4d0   : > { %2052 = vmatprep.subr.bf16.mxu0 %v1591_v61  ;;  %2069 = vmatprep.subr.bf16.mxu1 %v1591_v61 }
 0x4d1   : > { %2053 = vmatpush3.bf16.msra.mxu0 %v1591_v61  ;;  %2077 = vmatpush3.bf16.msra.mxu1 %v1591_v61 }
 0x4d4   : > { %2055 = vmatmul.mubr.msk.bf16.vlgmr.msra.gmra.mrb[16].mxu0 %vm2922_vm1, %v2310_v45  ;;  %2059 = vmatmul.mubr.msk.bf16.vlgmr.msra.gmra.mrb[16].mxu1 %vm2926_vm3, %v2310_v45 }
 0x5a7   : > { %v2056_v5 = vpop.f32.mrb[16].mxu0  ;;  %v2060_v25 = vpop.f32.mrb[16].mxu1  ;;  %1677 = sbr.rel (%p1951_p6) target bundleno = 1738 (0x6ca), region = 52 }
 0x5a8   : > { %v1659_v29 = vadd.f32 %v2056_v5, %v1578_v44  ;;  %v1663_v13 = vadd.f32 %v2060_v25, %v1582_v1  ;;  %v1626_v8 = vpop.f32.mrb[17].mxu0  ;;  %v1642_v12 = vpop.f32.mrb[17].mxu1 }
 0x5a9   : > { %v1657_v17 = vadd.f32 %v1626_v8, %v1576_v3  ;;  %v1661_v53 = vadd.f32 %v1642_v12, %v1580_v52  ;;  %v2057_v18 = vpop.f32.mrb[18].mxu0  ;;  %v2061_v16 = vpop.f32.mrb[18].mxu1 }
 0x5aa   : > { %1668 = vst.msk [vmem:[#allocation4 + $0x10] sm:$0xff] %vm1665_vm7, %v1659_v29  ;;  %1672 = vst.msk [vmem:[#allocation4 + $0x30] sm:$0xff] %vm1665_vm7, %v1663_v13  ;;  %v1660_v45 = vadd.f32 %v2057_v18, %v1579_v48  ;;  %v1664_v28 = vadd.f32 %v2061_v16, %v1583_v7  ;;  %v1629_v20 = vpop.f32.mrb[19].mxu0  ;;  %v1645_v9 = vpop.f32.mrb[19].mxu1 }
 0x5ab   : > { %1666 = vst.msk [vmem:[#allocation4] sm:$0xff] %vm1665_vm7, %v1657_v17  ;;  %1670 = vst.msk [vmem:[#allocation4 + $0x20] sm:$0xff] %vm1665_vm7, %v1661_v53  ;;  %v1658_v22 = vadd.f32 %v1629_v20, %v1577_v54  ;;  %v1662_v11 = vadd.f32 %v1645_v9, %v1581_v38 }
 0x5ac   : > { %1669 = vst.msk [vmem:[#allocation4 + $0x18] sm:$0xff] %vm1665_vm7, %v1660_v45  ;;  %1673 = vst.msk [vmem:[#allocation4 + $0x38] sm:$0xff] %vm1665_vm7, %v1664_v28 }
 0x5ad   : > { %1667 = vst.msk [vmem:[#allocation4 + $0x8] sm:$0xff] %vm1665_vm7, %v1658_v22  ;;  %1671 = vst.msk [vmem:[#allocation4 + $0x28] sm:$0xff] %vm1665_vm7, %v1662_v11 }
 0x5b1   : > { %v3005_v31 = vld [vmem:[#allocation4 + $0x10] sm:$0xff] }
 0x5b2   : > { %v3007_v30 = vld [vmem:[#allocation4] sm:$0xff]  ;;  %vm1688_vm5 = vcmp.eq.f32.partialorder %v3005_v31, 0.0  ;;  %v3029_v39 = vld [vmem:[#allocation4 + $0x30] sm:$0xff] }
 0x5b3   : > { %v3009_v32 = vld [vmem:[#allocation4 + $0x18] sm:$0xff]  ;;  %vm1686_vm6 = vcmp.eq.f32.partialorder %v3007_v30, 0.0  ;;  %v3018_v59 = vld [vmem:[#allocation4 + $0x20] sm:$0xff]  ;;  %v1696_v19 = vsel %vm1688_vm5, 1.0, %v3005_v31  ;;  %vm1692_vm13 = vcmp.eq.f32.partialorder %v3029_v39, 0.0 }
 0x5b4   : > { %vm1689_vm8 = vcmp.eq.f32.partialorder %v3009_v32, 0.0  ;;  %v3014_v50 = vld [vmem:[#allocation4 + $0x8] sm:$0xff]  ;;  %v1694_v33 = vsel %vm1686_vm6, 1.0, %v3007_v30  ;;  %2278 = vrcp.f32 %v1696_v19  ;;  %vm1690_vm11 = vcmp.eq.f32.partialorder %v3018_v59, 0.0  ;;  %v3027_v36 = vld [vmem:[#allocation4 + $0x38] sm:$0xff] }
 0x5b5   : > { %v3016_v46 = vld [vmem:[#allocation4 + $0x28] sm:$0xff]  ;;  %v1697_v34 = vsel %vm1689_vm8, 1.0, %v3009_v32  ;;  %vm1687_vm9 = vcmp.eq.f32.partialorder %v3014_v50, 0.0  ;;  %2280 = vrcp.f32 %v1694_v33  ;;  %v1698_v42 = vsel %vm1690_vm11, 1.0, %v3018_v59 }
 0x5b6   : > { %v1695_v10 = vsel %vm1687_vm9, 1.0, %v3014_v50  ;;  %vm1691_vm10 = vcmp.eq.f32.partialorder %v3016_v46, 0.0  ;;  %2282 = vrcp.f32 %v1697_v34  ;;  %vm1693_vm12 = vcmp.eq.f32.partialorder %v3027_v36, 0.0 }
 0x5b7   : > { %2284 = vrcp.f32 %v1695_v10  ;;  %v1699_v55 = vsel %vm1691_vm10, 1.0, %v3016_v46  ;;  %v1701_v51 = vsel %vm1693_vm12, 1.0, %v3027_v36  ;;  %v1700_v15 = vsel %vm1692_vm13, 1.0, %v3029_v39 }
 0x5b8   : > { %2286 = vrcp.f32 %v1699_v55 }
 0x5b9   : > { %2288 = vrcp.f32 %v1698_v42 }
 0x5ba   : > { %2290 = vrcp.f32 %v1701_v51 }
 0x5bb   : > { %2292 = vrcp.f32 %v1700_v15 }
 0x5be   : > { %v2279_v37 = vpop.eup %2278 }
 0x5bf   : > { %v2281_v41 = vpop.eup %2280  ;;  %1767 = vperm.xlu1 %2274, %v2279_v37  }
 0x5c0   : > { %v2283_v23 = vpop.eup %2282  ;;  %1759 = vperm.xlu0 %2273, %v2281_v41  }
 0x5c1   : > { %v2285_v56 = vpop.eup %2284 }
 0x5c2   : > { %v2287_v21 = vpop.eup %2286 }
 0x5c3   : > { %1771 = vperm.xlu1 %2274, %v2283_v23   ;;  %v2289_v58 = vpop.eup %2288 }
 0x5c4   : > { %1763 = vperm.xlu0 %2273, %v2285_v56   ;;  %v2291_v4 = vpop.eup %2290 }
 0x5c5   : > { %v2293_v47 = vpop.eup %2292 }
 0x5c7   : > { %1779 = vperm.xlu1 %2274, %v2287_v21  }
 0x5c8   : > { %1775 = vperm.xlu0 %2273, %v2289_v58  }
 0x5cb   : > { %1787 = vperm.xlu1 %2274, %v2291_v4  }
 0x5cc   : > { %1783 = vperm.xlu0 %2273, %v2293_v47  }
 0x5cf   : > { %2276 = vset.pattern.permute.xlu1 %v2312_v60 }
 0x5d0   : > { %2275 = vset.pattern.permute.xlu0 %v2312_v60  ;;  %1717 = vperm.xlu1 %2276, %v2285_v56  }
 0x5d1   : > { %1712 = vperm.xlu0 %2275, %v2281_v41  }
 0x5d4   : > { %1722 = vperm.xlu1 %2276, %v2279_v37  }
 0x5d5   : > { %1727 = vperm.xlu0 %2275, %v2283_v23  }
 0x5d8   : > { %1732 = vperm.xlu1 %2276, %v2289_v58  }
 0x5d9   : > { %1737 = vperm.xlu0 %2275, %v2287_v21  }
 0x5dc   : > { %1742 = vperm.xlu1 %2276, %v2293_v47  }
 0x5dd   : > { %1747 = vperm.xlu0 %2275, %v2291_v4  }
 0x5e1   : > { %2277 = vset.pattern.permute.xlu0 %v2311_v40 }
 0x63e   : > { %v1768_v57 = vpop.permute.xlu1 %1767 }
 0x63f   : > { %v1760_v63 = vpop.permute.xlu0 %1759  ;;  %v1792_v35 = vmul.f32 %v1768_v57, %v3005_v31 }
 0x640   : > { %v1790_v2 = vmul.f32 %v1760_v63, %v3007_v30 }
 0x642   : > { %1806 = vrot.lane.b32.xlu1 %v1790_v2, %s2313_s27  ;;  %v1772_v26 = vpop.permute.xlu1 %1771 }
 0x643   : > { %v1764_v43 = vpop.permute.xlu0 %1763  ;;  %v1793_v49 = vmul.f32 %v1772_v26, %v3009_v32 }
 0x644   : > { %v1791_v62 = vmul.f32 %v1764_v43, %v3014_v50 }
 0x646   : > { %1810 = vrot.lane.b32.xlu1 %v1792_v35, %s2313_s27  ;;  %1808 = vrot.lane.b32.xlu0 %v1791_v62, %s2313_s27  ;;  %v1780_v14 = vpop.permute.xlu1 %1779 }
 0x647   : > { %v1776_v24 = vpop.permute.xlu0 %1775  ;;  %v1795_v6 = vmul.f32 %v1780_v14, %v3016_v46 }
 0x648   : > { %v1794_v27 = vmul.f32 %v1776_v24, %v3018_v59 }
 0x64a   : > { %1812 = vrot.lane.b32.xlu0 %v1793_v49, %s2313_s27  ;;  %1814 = vrot.lane.b32.xlu1 %v1794_v27, %s2313_s27  ;;  %v1788_v44 = vpop.permute.xlu1 %1787 }
 0x64b   : > { %v1784_v0 = vpop.permute.xlu0 %1783  ;;  %v1797_v1 = vmul.f32 %v1788_v44, %v3027_v36 }
 0x64c   : > { %v1796_v61 = vmul.f32 %v1784_v0, %v3029_v39 }
 0x64e   : > { %1816 = vrot.lane.b32.xlu0 %v1795_v6, %s2313_s27  ;;  %1818 = vrot.lane.b32.xlu1 %v1796_v61, %s2313_s27 }
 0x64f   : > { %v1718_v3 = vpop.permute.xlu1 %1717 }
 0x650   : > { %v1713_v52 = vpop.permute.xlu0 %1712  ;;  %v1751_v38 = vmul.f32 %v1718_v3, %v3014_v50 }
 0x651   : > { %v1750_v13 = vmul.f32 %v1713_v52, %v3007_v30 }
 0x652   : > { %1820 = vrot.lane.b32.xlu0 %v1797_v1, %s2313_s27 }
 0x653   : > { %v1723_v5 = vpop.permute.xlu1 %1722 }
 0x654   : > { %v1728_v25 = vpop.permute.xlu0 %1727  ;;  %v1752_v17 = vmul.f32 %v1723_v5, %v3005_v31 }
 0x655   : > { %v1753_v20 = vmul.f32 %v1728_v25, %v3009_v32 }
 0x657   : > { %v1733_v48 = vpop.permute.xlu1 %1732 }
 0x658   : > { %v1738_v7 = vpop.permute.xlu0 %1737  ;;  %v1754_v9 = vmul.f32 %v1733_v48, %v3018_v59 }
 0x659   : > { %v1755_v32 = vmul.f32 %v1738_v7, %v3016_v46 }
 0x65b   : > { %v1743_v29 = vpop.permute.xlu1 %1742 }
 0x65c   : > { %v1748_v8 = vpop.permute.xlu0 %1747  ;;  %v1756_v59 = vmul.f32 %v1743_v29, %v3029_v39 }
 0x65d   : > { %v1757_v46 = vmul.f32 %v1748_v8, %v3027_v36 }
 0x6b4   : > { %v1807_v12 = vpop.permute.xlu1 %1806 }
 0x6b5   : > { %v1830_v54 = vadd.f32 %v1807_v12, %v1750_v13 }
 0x6b7   : > { %v1838_v53 = vmul.f32 0.5, %v1830_v54 }
 0x6b8   : > { %v1811_v18 = vpop.permute.xlu1 %1810  ;;  %v1809_v16 = vpop.permute.xlu0 %1808 }
 0x6b9   : > { %1846 = vst.msk [vmem:[%s3095_s7] sm:$0xff] %vm1543_vm4, %v1838_v53  ;;  %v1832_v45 = vadd.f32 %v1811_v18, %v1752_v17  ;;  %v1831_v28 = vadd.f32 %v1809_v16, %v1751_v38 }
 0x6bb   : > { %v1840_v22 = vmul.f32 0.5, %v1832_v45  ;;  %v1839_v11 = vmul.f32 0.5, %v1831_v28 }
 0x6bc   : > { %v1815_v30 = vpop.permute.xlu1 %1814  ;;  %v1813_v40 = vpop.permute.xlu0 %1812 }
 0x6bd   : > { %1848 = vst.msk [vmem:[%s3095_s7 + $0x10] sm:$0xff] %vm1543_vm4, %v1840_v22  ;;  %1847 = vst.msk [vmem:[%s3095_s7 + $0x8] sm:$0xff] %vm1543_vm4, %v1839_v11  ;;  %v1834_v31 = vadd.f32 %v1815_v30, %v1754_v9  ;;  %v1833_v50 = vadd.f32 %v1813_v40, %v1753_v20 }
 0x6bf   : > { %v1842_v19 = vmul.f32 0.5, %v1834_v31  ;;  %v1841_v33 = vmul.f32 0.5, %v1833_v50 }
 0x6c0   : > { %v1819_v34 = vpop.permute.xlu1 %1818  ;;  %v1817_v10 = vpop.permute.xlu0 %1816 }
 0x6c1   : > { %1850 = vst.msk [vmem:[%s3095_s7 + $0x20] sm:$0xff] %vm1543_vm4, %v1842_v19  ;;  %1849 = vst.msk [vmem:[%s3095_s7 + $0x18] sm:$0xff] %vm1543_vm4, %v1841_v33  ;;  %v1836_v55 = vadd.f32 %v1819_v34, %v1756_v59  ;;  %v1835_v42 = vadd.f32 %v1817_v10, %v1755_v32 }
 0x6c3   : > { %v1844_v51 = vmul.f32 0.5, %v1836_v55  ;;  %v1843_v39 = vmul.f32 0.5, %v1835_v42 }
 0x6c4   : > { %v1821_v15 = vpop.permute.xlu0 %1820 }
 0x6c5   : > { %1852 = vst.msk [vmem:[%s3095_s7 + $0x30] sm:$0xff] %vm1543_vm4, %v1844_v51  ;;  %1851 = vst.msk [vmem:[%s3095_s7 + $0x28] sm:$0xff] %vm1543_vm4, %v1843_v39  ;;  %v1837_v37 = vadd.f32 %v1821_v15, %v1757_v46 }
 0x6c7   : > { %v1845_v41 = vmul.f32 0.5, %v1837_v37 }
 0x6c9   : > { %1853 = vst.msk [vmem:[%s3095_s7 + $0x38] sm:$0xff] %vm1543_vm4, %v1845_v41 }
 0x6ca PF: > { %s18_s26 = sadd.s32 1, %s2300_s26  }
 0x6cb   : > { %p15_p7 = scmp.ge.s32.totalorder %s18_s26, 4  }
 0x6cd   :  { %17 = sbr.rel (!%p15_p7) target bundleno = 2 (0x2), region = 87 }

</bundles_post_ra>
